<compile_context>
chip_gen: v7x
topology: tpu7x:2x2x1
jax: 0.10.0
libtpu: 0.0.40
codegen_flags: <defaults>
</compile_context>

<pallas_src>
import jax
import jax.numpy as jnp
from jax.experimental import pallas as pl
from jax.experimental.pallas import tpu as pltpu


def _round_up(x, m):
    return (x + m - 1) // m * m


def _generic_block_kernel(
    x_ref,                               # [row_tile, L_in]   (bf16)
    w1, b1, w2, b2, w3, b3, w4, b4,      # theta-generator trunk (padded)
    w_th, b_th,                          # packed theta heads  [theta_b | theta_f | 0..]
    w_hd, b_hd,                          # packed output heads [backcast | forecast | 0..]
    out_ref,                             # [row_tile, O_p]    (f32)
):
    x = x_ref[...]

    def linear(h, w_ref, b_ref):
        # Only the MXU operands are in the weight dtype (bf16); accumulation,
        # bias add and ReLU stay f32 (also correct on v5e's f32-only VPU).
        return (
            jnp.dot(h.astype(w_ref.dtype), w_ref[...],
                    preferred_element_type=jnp.float32)
            + b_ref[...]
        )

    h = jnp.maximum(linear(x, w1, b1), 0.0)
    h = jnp.maximum(linear(h, w2, b2), 0.0)
    h = jnp.maximum(linear(h, w3, b3), 0.0)
    h = jnp.maximum(linear(h, w4, b4), 0.0)

    # One matmul for both theta heads: theta[:, :T]=theta_b, theta[:, T:2T]=theta_f.
    theta = linear(h, w_th, b_th)

    # One block-structured matmul producing the packed, lane-dense
    # [backcast | forecast] output slab (backcast depends only on theta_b,
    # forecast only on theta_f because of the zero block structure in w_hd).
    out_ref[...] = linear(theta, w_hd, b_hd).astype(out_ref.dtype)


def prepare_padded_params(params, *, weight_dtype=jnp.bfloat16):
    """Pad / pack the Linear parameters once on the host.

    * trunk feature dims zero-padded to 128 lanes (math is unchanged),
    * both theta heads packed into a single round_up(2*T, 128)-lane slab,
    * both output heads packed into a single round_up(L+F, 128)-lane slab,
    * weights cast to `weight_dtype` (bf16: MXU-native, half the weight DMA).
    """
    L, H = params["w1"].shape
    T = params["w_tb"].shape[1]
    F = params["w_fc"].shape[1]
    L_in = _round_up(L, 8)                 # contraction dim of the 1st matmul
    Hp = _round_up(H, 128)
    Th_p = _round_up(2 * T, 128)           # packed theta slab width
    O_p = _round_up(L + F, 128)            # packed [backcast | forecast] width

    def pad_w(w, rp, cp):
        return jnp.zeros((rp, cp), w.dtype).at[: w.shape[0], : w.shape[1]].set(w)

    def pad_b(b, cp):
        return jnp.zeros((1, cp), b.dtype).at[:, : b.shape[1]].set(b)

    p = {}
    p["w1"], p["b1"] = pad_w(params["w1"], L_in, Hp), pad_b(params["b1"], Hp)
    p["w2"], p["b2"] = pad_w(params["w2"], Hp, Hp), pad_b(params["b2"], Hp)
    p["w3"], p["b3"] = pad_w(params["w3"], Hp, Hp), pad_b(params["b3"], Hp)
    p["w4"], p["b4"] = pad_w(params["w4"], Hp, Hp), pad_b(params["b4"], Hp)

    # Packed theta heads: cols [0,T) <- theta_b, cols [T,2T) <- theta_f.
    w_th = jnp.zeros((Hp, Th_p), params["w_tb"].dtype)
    w_th = w_th.at[:H, :T].set(params["w_tb"])
    w_th = w_th.at[:H, T:2 * T].set(params["w_tf"])
    b_th = jnp.zeros((1, Th_p), params["b_tb"].dtype)
    b_th = b_th.at[:, :T].set(params["b_tb"])
    b_th = b_th.at[:, T:2 * T].set(params["b_tf"])
    p["w_th"], p["b_th"] = w_th, b_th

    # Packed output heads with block structure: rows [0,T) x cols [0,L) = w_bc,
    # rows [T,2T) x cols [L,L+F) = w_fc, everything else zero.
    w_hd = jnp.zeros((Th_p, O_p), params["w_bc"].dtype)
    w_hd = w_hd.at[:T, :L].set(params["w_bc"])
    w_hd = w_hd.at[T:2 * T, L:L + F].set(params["w_fc"])
    b_hd = jnp.zeros((1, O_p), params["b_bc"].dtype)
    b_hd = b_hd.at[:, :L].set(params["b_bc"])
    b_hd = b_hd.at[:, L:L + F].set(params["b_fc"])
    p["w_hd"], p["b_hd"] = w_hd, b_hd

    # Weights bf16 (MXU operands); biases stay f32 (added to the f32 acc).
    for k in list(p):
        if k.startswith("w"):
            p[k] = p[k].astype(weight_dtype)

    dims = dict(L=L, H=H, T=T, F=F, L_in=L_in, Hp=Hp, Th_p=Th_p, O_p=O_p)
    return p, dims


def _pick_row_tile(m, *, desired=512, min_steps=4):
    """Row tile: a multiple of 128 (MXU / lane friendly), large enough to
    amortize the ~0.35us per-grid-step overhead, small enough that the grid
    has >= min_steps steps so each v7x TensorCore gets >= 2 pipelined steps.
    (On a single-TC v6e with large m this still yields >= 512-row tiles.)"""
    if m <= 128:
        return _round_up(m, 8)
    tile = min(desired, _round_up(m, 128) // min_steps)
    return max(128, (tile // 128) * 128)


def generic_block_forward(x, params, *, weight_dtype=jnp.bfloat16, row_tile=None):
    """x: [batch, num_nodes, backcast_length] float32 ->
       (backcast [B,N,backcast_length], forecast [B,N,forecast_length])."""
    batch, num_nodes, backcast_length = x.shape
    padded, dims = prepare_padded_params(params, weight_dtype=weight_dtype)
    L, F = dims["L"], dims["F"]
    L_in, Hp, Th_p, O_p = dims["L_in"], dims["Hp"], dims["Th_p"], dims["O_p"]
    assert backcast_length == L

    m = batch * num_nodes
    if row_tile is None:
        row_tile = _pick_row_tile(m)
    m_pad = _round_up(m, row_tile)

    # x as bf16, no 128-lane padding (block last dim == full array dim is
    # legal). At the demo size m_pad == m and L_in == L, so this is a pure
    # reshape + cast with no host-side pad kernel.
    x2d = x.reshape(m, L).astype(weight_dtype)
    if m_pad != m or L_in != L:
        x2d = jnp.zeros((m_pad, L_in), weight_dtype).at[:m, :L].set(x2d)

    weight_order = [
        ("w1", "b1"), ("w2", "b2"), ("w3", "b3"), ("w4", "b4"),
        ("w_th", "b_th"), ("w_hd", "b_hd"),
    ]
    weight_args = []
    for wname, bname in weight_order:
        weight_args += [padded[wname], padded[bname]]

    grid = (m_pad // row_tile,)
    weight_bytes = sum(int(a.size) * a.dtype.itemsize for a in weight_args)
    flops = 2 * m_pad * (L_in * Hp + 3 * Hp * Hp + Hp * Th_p + Th_p * O_p)
    bytes_accessed = (int(x2d.size) * x2d.dtype.itemsize
                      + m_pad * O_p * 4
                      + weight_bytes)

    def run(single_buffer_weights):
        def weight_spec(arr):
            kwargs = {}
            if single_buffer_weights:
                # Grid-invariant block (same index every step): one buffer is
                # enough; halves the weight VMEM footprint.
                kwargs["pipeline_mode"] = pl.Buffered(buffer_count=1)
            return pl.BlockSpec(arr.shape, lambda i: (0, 0), **kwargs)

        # Derived VMEM need (+ headroom), so the config stays safe on v7x's
        # 64 MiB physical VMEM even if row_tile / dims are scaled up.
        vmem_need = (
            2 * row_tile * L_in * x2d.dtype.itemsize          # x tile, dbl-buf
            + 2 * row_tile * O_p * 4                          # out tile, dbl-buf
            + (1 if single_buffer_weights else 2) * weight_bytes
            + 2 * row_tile * (Hp + Th_p) * 4                  # live f32 intermediates
        )
        vmem_limit = int(min(64 * 1024 * 1024,
                             max(8 * 1024 * 1024, 4 * vmem_need)))

        out2d = pl.pallas_call(
            _generic_block_kernel,
            out_shape=jax.ShapeDtypeStruct((m_pad, O_p), jnp.float32),
            grid_spec=pltpu.PrefetchScalarGridSpec(
                num_scalar_prefetch=0,
                grid=grid,
                in_specs=[pl.BlockSpec((row_tile, L_in), lambda i: (i, 0))]
                + [weight_spec(a) for a in weight_args],
                out_specs=pl.BlockSpec((row_tile, O_p), lambda i: (i, 0)),
            ),
            compiler_params=pltpu.CompilerParams(
                dimension_semantics=("parallel",),
                vmem_limit_bytes=vmem_limit,
            ),
            cost_estimate=pl.CostEstimate(
                flops=flops, transcendentals=0, bytes_accessed=bytes_accessed),
        )(x2d, *weight_args)
        return jax.block_until_ready(out2d)

    try:
        out2d = run(single_buffer_weights=True)
    except Exception:
        # JAX version that rejects pl.Buffered(1) on inputs: fall back to the
        # default double-buffered weight specs (numerically identical).
        out2d = run(single_buffer_weights=False)

    backcast = out2d[:m, :L].reshape(batch, num_nodes, L)
    forecast = out2d[:m, L:L + F].reshape(batch, num_nodes, F)
    return backcast, forecast


def init_params(key, hidden_dim, theta_dim, backcast_length, forecast_length):
    """Deterministic PyTorch-Linear-style init. Weights stored (in, out), f32."""
    def linear_init(key, fan_in, fan_out):
        kw, kb = jax.random.split(key)
        bound = 1.0 / jnp.sqrt(fan_in)
        w = jax.random.uniform(kw, (fan_in, fan_out), jnp.float32, -bound, bound)
        b = jax.random.uniform(kb, (1, fan_out), jnp.float32, -bound, bound)
        return w, b

    keys = jax.random.split(key, 8)
    params = {}
    params["w1"], params["b1"] = linear_init(keys[0], backcast_length, hidden_dim)
    params["w2"], params["b2"] = linear_init(keys[1], hidden_dim, hidden_dim)
    params["w3"], params["b3"] = linear_init(keys[2], hidden_dim, hidden_dim)
    params["w4"], params["b4"] = linear_init(keys[3], hidden_dim, hidden_dim)
    params["w_tb"], params["b_tb"] = linear_init(keys[4], hidden_dim, theta_dim)
    params["w_tf"], params["b_tf"] = linear_init(keys[5], hidden_dim, theta_dim)
    params["w_bc"], params["b_bc"] = linear_init(keys[6], theta_dim, backcast_length)
    params["w_fc"], params["b_fc"] = linear_init(keys[7], theta_dim, forecast_length)
    return params


def reference_forward(x, params):
    """Pure-JAX f32 reference mirroring the PyTorch module semantics."""
    def lin(h, w, b):
        return h @ w + b

    h = jax.nn.relu(lin(x, params["w1"], params["b1"]))
    h = jax.nn.relu(lin(h, params["w2"], params["b2"]))
    h = jax.nn.relu(lin(h, params["w3"], params["b3"]))
    h = jax.nn.relu(lin(h, params["w4"], params["b4"]))
    theta_b = lin(h, params["w_tb"], params["b_tb"])
    theta_f = lin(h, params["w_tf"], params["b_tf"])
    backcast = lin(theta_b, params["w_bc"], params["b_bc"])
    forecast = lin(theta_f, params["w_fc"], params["b_fc"])
    return backcast, forecast


if __name__ == "__main__":
    # Small shapes consistent with the module. M = batch*num_nodes = 512 so
    # the grid has 4 parallel 128-row steps (>= 2 per v7x TensorCore).
    batch = 4
    num_nodes = 128
    backcast_length = 16   # == sequence_length of the input
    forecast_length = 8
    hidden_dim = 32
    theta_dim = 8

    key = jax.random.PRNGKey(0)
    key_x, key_p = jax.random.split(key)

    x = jax.random.normal(
        key_x, (batch, num_nodes, backcast_length), dtype=jnp.float32
    )
    params = init_params(key_p, hidden_dim, theta_dim, backcast_length, forecast_length)

    backcast, forecast = generic_block_forward(x, params)
    backcast = jax.block_until_ready(backcast)
    forecast = jax.block_until_ready(forecast)

    # Correctness check against pure-JAX f32 reference. Tolerance loosened for
    # bf16 MXU operands (accumulation is still f32).
    ref_backcast, ref_forecast = reference_forward(x, params)
    assert backcast.shape == (batch, num_nodes, backcast_length)
    assert forecast.shape == (batch, num_nodes, forecast_length)
    assert jnp.allclose(backcast, ref_backcast, atol=5e-2, rtol=5e-2)
    assert jnp.allclose(forecast, ref_forecast, atol=5e-2, rtol=5e-2)

    print("KERNEL_OK")
</pallas_src>

<mosaic_0001>
module attributes {stable_mosaic.version = 11 : i64} {
  func.func @_generic_block_kernel(%arg0: i32, %arg1: memref<128x16xbf16, #tpu.memory_space<vmem>>, %arg2: memref<16x128xbf16, #tpu.memory_space<vmem>>, %arg3: memref<1x128xf32, #tpu.memory_space<vmem>>, %arg4: memref<128x128xbf16, #tpu.memory_space<vmem>>, %arg5: memref<1x128xf32, #tpu.memory_space<vmem>>, %arg6: memref<128x128xbf16, #tpu.memory_space<vmem>>, %arg7: memref<1x128xf32, #tpu.memory_space<vmem>>, %arg8: memref<128x128xbf16, #tpu.memory_space<vmem>>, %arg9: memref<1x128xf32, #tpu.memory_space<vmem>>, %arg10: memref<128x128xbf16, #tpu.memory_space<vmem>>, %arg11: memref<1x128xf32, #tpu.memory_space<vmem>>, %arg12: memref<128x128xbf16, #tpu.memory_space<vmem>>, %arg13: memref<1x128xf32, #tpu.memory_space<vmem>>, %arg14: memref<128x128xf32, #tpu.memory_space<vmem>>) attributes {dimension_semantics = [#tpu.dimension_semantics<parallel>], iteration_bounds = array<i64: 4>, scalar_prefetch = 0 : i64, scratch_operands = 0 : i64, tpu.core_type = #tpu.core_type<tc>, window_params = [{transform_indices = @transform_0, window_bounds = array<i64: 128, 16>}, {pipeline_mode = #tpu.pipeline_mode<synchronous>, transform_indices = @transform_1, window_bounds = array<i64: 16, 128>}, {pipeline_mode = #tpu.pipeline_mode<synchronous>, transform_indices = @transform_2, window_bounds = array<i64: 1, 128>}, {pipeline_mode = #tpu.pipeline_mode<synchronous>, transform_indices = @transform_3, window_bounds = array<i64: 128, 128>}, {pipeline_mode = #tpu.pipeline_mode<synchronous>, transform_indices = @transform_4, window_bounds = array<i64: 1, 128>}, {pipeline_mode = #tpu.pipeline_mode<synchronous>, transform_indices = @transform_5, window_bounds = array<i64: 128, 128>}, {pipeline_mode = #tpu.pipeline_mode<synchronous>, transform_indices = @transform_6, window_bounds = array<i64: 1, 128>}, {pipeline_mode = #tpu.pipeline_mode<synchronous>, transform_indices = @transform_7, window_bounds = array<i64: 128, 128>}, {pipeline_mode = #tpu.pipeline_mode<synchronous>, transform_indices = @transform_8, window_bounds = array<i64: 1, 128>}, {pipeline_mode = #tpu.pipeline_mode<synchronous>, transform_indices = @transform_9, window_bounds = array<i64: 128, 128>}, {pipeline_mode = #tpu.pipeline_mode<synchronous>, transform_indices = @transform_10, window_bounds = array<i64: 1, 128>}, {pipeline_mode = #tpu.pipeline_mode<synchronous>, transform_indices = @transform_11, window_bounds = array<i64: 128, 128>}, {pipeline_mode = #tpu.pipeline_mode<synchronous>, transform_indices = @transform_12, window_bounds = array<i64: 1, 128>}, {transform_indices = @transform_13, window_bounds = array<i64: 128, 128>}]} {
    %c0 = arith.constant 0 : index
    %c0_0 = arith.constant 0 : index
    %0 = vector.load %arg1[%c0, %c0_0] : memref<128x16xbf16, #tpu.memory_space<vmem>>, vector<128x16xbf16>
    %c0_1 = arith.constant 0 : index
    %c0_2 = arith.constant 0 : index
    %1 = vector.load %arg2[%c0_1, %c0_2] : memref<16x128xbf16, #tpu.memory_space<vmem>>, vector<16x128xbf16>
    %cst = arith.constant dense<0.000000e+00> : vector<128x128xf32>
    %2 = tpu.matmul %0, %1, %cst {dimension_numbers = #tpu.dot_dimension_numbers<[1], [0], [0], [1], [0, 0, 1, 1], [], []>} : vector<128x16xbf16>, vector<16x128xbf16>, vector<128x128xf32> -> vector<128x128xf32>
    %c0_3 = arith.constant 0 : index
    %c0_4 = arith.constant 0 : index
    %3 = vector.load %arg3[%c0_3, %c0_4] : memref<1x128xf32, #tpu.memory_space<vmem>>, vector<1x128xf32>
    %4 = vector.broadcast %3 : vector<1x128xf32> to vector<128x128xf32>
    %5 = arith.addf %2, %4 : vector<128x128xf32>
    %cst_5 = arith.constant 0.000000e+00 : f32
    %6 = vector.broadcast %cst_5 : f32 to vector<128x128xf32>
    %7 = arith.maximumf %5, %6 : vector<128x128xf32>
    %8 = arith.truncf %7 : vector<128x128xf32> to vector<128x128xbf16>
    %c0_6 = arith.constant 0 : index
    %c0_7 = arith.constant 0 : index
    %9 = vector.load %arg4[%c0_6, %c0_7] : memref<128x128xbf16, #tpu.memory_space<vmem>>, vector<128x128xbf16>
    %cst_8 = arith.constant dense<0.000000e+00> : vector<128x128xf32>
    %10 = tpu.matmul %8, %9, %cst_8 {dimension_numbers = #tpu.dot_dimension_numbers<[1], [0], [0], [1], [0, 0, 1, 1], [], []>} : vector<128x128xbf16>, vector<128x128xbf16>, vector<128x128xf32> -> vector<128x128xf32>
    %c0_9 = arith.constant 0 : index
    %c0_10 = arith.constant 0 : index
    %11 = vector.load %arg5[%c0_9, %c0_10] : memref<1x128xf32, #tpu.memory_space<vmem>>, vector<1x128xf32>
    %12 = vector.broadcast %11 : vector<1x128xf32> to vector<128x128xf32>
    %13 = arith.addf %10, %12 : vector<128x128xf32>
    %cst_11 = arith.constant 0.000000e+00 : f32
    %14 = vector.broadcast %cst_11 : f32 to vector<128x128xf32>
    %15 = arith.maximumf %13, %14 : vector<128x128xf32>
    %16 = arith.truncf %15 : vector<128x128xf32> to vector<128x128xbf16>
    %c0_12 = arith.constant 0 : index
    %c0_13 = arith.constant 0 : index
    %17 = vector.load %arg6[%c0_12, %c0_13] : memref<128x128xbf16, #tpu.memory_space<vmem>>, vector<128x128xbf16>
    %cst_14 = arith.constant dense<0.000000e+00> : vector<128x128xf32>
    %18 = tpu.matmul %16, %17, %cst_14 {dimension_numbers = #tpu.dot_dimension_numbers<[1], [0], [0], [1], [0, 0, 1, 1], [], []>} : vector<128x128xbf16>, vector<128x128xbf16>, vector<128x128xf32> -> vector<128x128xf32>
    %c0_15 = arith.constant 0 : index
    %c0_16 = arith.constant 0 : index
    %19 = vector.load %arg7[%c0_15, %c0_16] : memref<1x128xf32, #tpu.memory_space<vmem>>, vector<1x128xf32>
    %20 = vector.broadcast %19 : vector<1x128xf32> to vector<128x128xf32>
    %21 = arith.addf %18, %20 : vector<128x128xf32>
    %cst_17 = arith.constant 0.000000e+00 : f32
    %22 = vector.broadcast %cst_17 : f32 to vector<128x128xf32>
    %23 = arith.maximumf %21, %22 : vector<128x128xf32>
    %24 = arith.truncf %23 : vector<128x128xf32> to vector<128x128xbf16>
    %c0_18 = arith.constant 0 : index
    %c0_19 = arith.constant 0 : index
    %25 = vector.load %arg8[%c0_18, %c0_19] : memref<128x128xbf16, #tpu.memory_space<vmem>>, vector<128x128xbf16>
    %cst_20 = arith.constant dense<0.000000e+00> : vector<128x128xf32>
    %26 = tpu.matmul %24, %25, %cst_20 {dimension_numbers = #tpu.dot_dimension_numbers<[1], [0], [0], [1], [0, 0, 1, 1], [], []>} : vector<128x128xbf16>, vector<128x128xbf16>, vector<128x128xf32> -> vector<128x128xf32>
    %c0_21 = arith.constant 0 : index
    %c0_22 = arith.constant 0 : index
    %27 = vector.load %arg9[%c0_21, %c0_22] : memref<1x128xf32, #tpu.memory_space<vmem>>, vector<1x128xf32>
    %28 = vector.broadcast %27 : vector<1x128xf32> to vector<128x128xf32>
    %29 = arith.addf %26, %28 : vector<128x128xf32>
    %cst_23 = arith.constant 0.000000e+00 : f32
    %30 = vector.broadcast %cst_23 : f32 to vector<128x128xf32>
    %31 = arith.maximumf %29, %30 : vector<128x128xf32>
    %32 = arith.truncf %31 : vector<128x128xf32> to vector<128x128xbf16>
    %c0_24 = arith.constant 0 : index
    %c0_25 = arith.constant 0 : index
    %33 = vector.load %arg10[%c0_24, %c0_25] : memref<128x128xbf16, #tpu.memory_space<vmem>>, vector<128x128xbf16>
    %cst_26 = arith.constant dense<0.000000e+00> : vector<128x128xf32>
    %34 = tpu.matmul %32, %33, %cst_26 {dimension_numbers = #tpu.dot_dimension_numbers<[1], [0], [0], [1], [0, 0, 1, 1], [], []>} : vector<128x128xbf16>, vector<128x128xbf16>, vector<128x128xf32> -> vector<128x128xf32>
    %c0_27 = arith.constant 0 : index
    %c0_28 = arith.constant 0 : index
    %35 = vector.load %arg11[%c0_27, %c0_28] : memref<1x128xf32, #tpu.memory_space<vmem>>, vector<1x128xf32>
    %36 = vector.broadcast %35 : vector<1x128xf32> to vector<128x128xf32>
    %37 = arith.addf %34, %36 : vector<128x128xf32>
    %38 = arith.truncf %37 : vector<128x128xf32> to vector<128x128xbf16>
    %c0_29 = arith.constant 0 : index
    %c0_30 = arith.constant 0 : index
    %39 = vector.load %arg12[%c0_29, %c0_30] : memref<128x128xbf16, #tpu.memory_space<vmem>>, vector<128x128xbf16>
    %cst_31 = arith.constant dense<0.000000e+00> : vector<128x128xf32>
    %40 = tpu.matmul %38, %39, %cst_31 {dimension_numbers = #tpu.dot_dimension_numbers<[1], [0], [0], [1], [0, 0, 1, 1], [], []>} : vector<128x128xbf16>, vector<128x128xbf16>, vector<128x128xf32> -> vector<128x128xf32>
    %c0_32 = arith.constant 0 : index
    %c0_33 = arith.constant 0 : index
    %41 = vector.load %arg13[%c0_32, %c0_33] : memref<1x128xf32, #tpu.memory_space<vmem>>, vector<1x128xf32>
    %42 = vector.broadcast %41 : vector<1x128xf32> to vector<128x128xf32>
    %43 = arith.addf %40, %42 : vector<128x128xf32>
    %c0_34 = arith.constant 0 : index
    %c0_35 = arith.constant 0 : index
    %44 = vector.load %arg14[%c0_34, %c0_35] : memref<128x128xf32, #tpu.memory_space<vmem>>, vector<128x128xf32>
    tpu.vector_store %arg14[%c0_34, %c0_35], %43 {strides = array<i32>} : memref<128x128xf32, #tpu.memory_space<vmem>>, vector<128x128xf32>,
    return
  }
  func.func @transform_0(%arg0: i32) -> (i32, i32) {
    %c0_i32 = arith.constant 0 : i32
    %c0_i32_0 = arith.constant 0 : i32
    return %arg0, %c0_i32 : i32, i32
  }
  func.func @transform_1(%arg0: i32) -> (i32, i32) {
    %c0_i32 = arith.constant 0 : i32
    %c0_i32_0 = arith.constant 0 : i32
    %c0_i32_1 = arith.constant 0 : i32
    return %c0_i32, %c0_i32_0 : i32, i32
  }
  func.func @transform_2(%arg0: i32) -> (i32, i32) {
    %c0_i32 = arith.constant 0 : i32
    %c0_i32_0 = arith.constant 0 : i32
    %c0_i32_1 = arith.constant 0 : i32
    return %c0_i32, %c0_i32_0 : i32, i32
  }
  func.func @transform_3(%arg0: i32) -> (i32, i32) {
    %c0_i32 = arith.constant 0 : i32
    %c0_i32_0 = arith.constant 0 : i32
    %c0_i32_1 = arith.constant 0 : i32
    return %c0_i32, %c0_i32_0 : i32, i32
  }
  func.func @transform_4(%arg0: i32) -> (i32, i32) {
    %c0_i32 = arith.constant 0 : i32
    %c0_i32_0 = arith.constant 0 : i32
    %c0_i32_1 = arith.constant 0 : i32
    return %c0_i32, %c0_i32_0 : i32, i32
  }
  func.func @transform_5(%arg0: i32) -> (i32, i32) {
    %c0_i32 = arith.constant 0 : i32
    %c0_i32_0 = arith.constant 0 : i32
    %c0_i32_1 = arith.constant 0 : i32
    return %c0_i32, %c0_i32_0 : i32, i32
  }
  func.func @transform_6(%arg0: i32) -> (i32, i32) {
    %c0_i32 = arith.constant 0 : i32
    %c0_i32_0 = arith.constant 0 : i32
    %c0_i32_1 = arith.constant 0 : i32
    return %c0_i32, %c0_i32_0 : i32, i32
  }
  func.func @transform_7(%arg0: i32) -> (i32, i32) {
    %c0_i32 = arith.constant 0 : i32
    %c0_i32_0 = arith.constant 0 : i32
    %c0_i32_1 = arith.constant 0 : i32
    return %c0_i32, %c0_i32_0 : i32, i32
  }
  func.func @transform_8(%arg0: i32) -> (i32, i32) {
    %c0_i32 = arith.constant 0 : i32
    %c0_i32_0 = arith.constant 0 : i32
    %c0_i32_1 = arith.constant 0 : i32
    return %c0_i32, %c0_i32_0 : i32, i32
  }
  func.func @transform_9(%arg0: i32) -> (i32, i32) {
    %c0_i32 = arith.constant 0 : i32
    %c0_i32_0 = arith.constant 0 : i32
    %c0_i32_1 = arith.constant 0 : i32
    return %c0_i32, %c0_i32_0 : i32, i32
  }
  func.func @transform_10(%arg0: i32) -> (i32, i32) {
    %c0_i32 = arith.constant 0 : i32
    %c0_i32_0 = arith.constant 0 : i32
    %c0_i32_1 = arith.constant 0 : i32
    return %c0_i32, %c0_i32_0 : i32, i32
  }
  func.func @transform_11(%arg0: i32) -> (i32, i32) {
    %c0_i32 = arith.constant 0 : i32
    %c0_i32_0 = arith.constant 0 : i32
    %c0_i32_1 = arith.constant 0 : i32
    return %c0_i32, %c0_i32_0 : i32, i32
  }
  func.func @transform_12(%arg0: i32) -> (i32, i32) {
    %c0_i32 = arith.constant 0 : i32
    %c0_i32_0 = arith.constant 0 : i32
    %c0_i32_1 = arith.constant 0 : i32
    return %c0_i32, %c0_i32_0 : i32, i32
  }
  func.func @transform_13(%arg0: i32) -> (i32, i32) {
    %c0_i32 = arith.constant 0 : i32
    %c0_i32_0 = arith.constant 0 : i32
    return %arg0, %c0_i32 : i32, i32
  }
}

module attributes {stable_mosaic.version = 11 : i64} {
  func.func @_generic_block_kernel(%arg0: i32, %arg1: memref<128x16xbf16, #tpu.memory_space<vmem>>, %arg2: memref<16x128xbf16, #tpu.memory_space<vmem>>, %arg3: memref<1x128xf32, #tpu.memory_space<vmem>>, %arg4: memref<128x128xbf16, #tpu.memory_space<vmem>>, %arg5: memref<1x128xf32, #tpu.memory_space<vmem>>, %arg6: memref<128x128xbf16, #tpu.memory_space<vmem>>, %arg7: memref<1x128xf32, #tpu.memory_space<vmem>>, %arg8: memref<128x128xbf16, #tpu.memory_space<vmem>>, %arg9: memref<1x128xf32, #tpu.memory_space<vmem>>, %arg10: memref<128x128xbf16, #tpu.memory_space<vmem>>, %arg11: memref<1x128xf32, #tpu.memory_space<vmem>>, %arg12: memref<128x128xbf16, #tpu.memory_space<vmem>>, %arg13: memref<1x128xf32, #tpu.memory_space<vmem>>, %arg14: memref<128x128xf32, #tpu.memory_space<vmem>>) attributes {dimension_semantics = [#tpu.dimension_semantics<parallel>], iteration_bounds = array<i64: 4>, scalar_prefetch = 0 : i64, scratch_operands = 0 : i64, tpu.core_type = #tpu.core_type<tc>, window_params = [{transform_indices = @transform_0, window_bounds = array<i64: 128, 16>}, {pipeline_mode = #tpu.pipeline_mode<synchronous>, transform_indices = @transform_1, window_bounds = array<i64: 16, 128>}, {pipeline_mode = #tpu.pipeline_mode<synchronous>, transform_indices = @transform_2, window_bounds = array<i64: 1, 128>}, {pipeline_mode = #tpu.pipeline_mode<synchronous>, transform_indices = @transform_3, window_bounds = array<i64: 128, 128>}, {pipeline_mode = #tpu.pipeline_mode<synchronous>, transform_indices = @transform_4, window_bounds = array<i64: 1, 128>}, {pipeline_mode = #tpu.pipeline_mode<synchronous>, transform_indices = @transform_5, window_bounds = array<i64: 128, 128>}, {pipeline_mode = #tpu.pipeline_mode<synchronous>, transform_indices = @transform_6, window_bounds = array<i64: 1, 128>}, {pipeline_mode = #tpu.pipeline_mode<synchronous>, transform_indices = @transform_7, window_bounds = array<i64: 128, 128>}, {pipeline_mode = #tpu.pipeline_mode<synchronous>, transform_indices = @transform_8, window_bounds = array<i64: 1, 128>}, {pipeline_mode = #tpu.pipeline_mode<synchronous>, transform_indices = @transform_9, window_bounds = array<i64: 128, 128>}, {pipeline_mode = #tpu.pipeline_mode<synchronous>, transform_indices = @transform_10, window_bounds = array<i64: 1, 128>}, {pipeline_mode = #tpu.pipeline_mode<synchronous>, transform_indices = @transform_11, window_bounds = array<i64: 128, 128>}, {pipeline_mode = #tpu.pipeline_mode<synchronous>, transform_indices = @transform_12, window_bounds = array<i64: 1, 128>}, {transform_indices = @transform_13, window_bounds = array<i64: 128, 128>}]} {
    %c0 = arith.constant 0 : index
    %c0_0 = arith.constant 0 : index
    %0 = vector.load %arg1[%c0, %c0_0] : memref<128x16xbf16, #tpu.memory_space<vmem>>, vector<128x16xbf16>
    %c0_1 = arith.constant 0 : index
    %c0_2 = arith.constant 0 : index
    %1 = vector.load %arg2[%c0_1, %c0_2] : memref<16x128xbf16, #tpu.memory_space<vmem>>, vector<16x128xbf16>
    %cst = arith.constant dense<0.000000e+00> : vector<128x128xf32>
    %2 = tpu.matmul %0, %1, %cst {dimension_numbers = #tpu.dot_dimension_numbers<[1], [0], [0], [1], [0, 0, 1, 1], [], []>} : vector<128x16xbf16>, vector<16x128xbf16>, vector<128x128xf32> -> vector<128x128xf32>
    %c0_3 = arith.constant 0 : index
    %c0_4 = arith.constant 0 : index
    %3 = vector.load %arg3[%c0_3, %c0_4] : memref<1x128xf32, #tpu.memory_space<vmem>>, vector<1x128xf32>
    %4 = vector.broadcast %3 : vector<1x128xf32> to vector<128x128xf32>
    %5 = arith.addf %2, %4 : vector<128x128xf32>
    %cst_5 = arith.constant 0.000000e+00 : f32
    %6 = vector.broadcast %cst_5 : f32 to vector<128x128xf32>
    %7 = arith.maximumf %5, %6 : vector<128x128xf32>
    %8 = arith.truncf %7 : vector<128x128xf32> to vector<128x128xbf16>
    %c0_6 = arith.constant 0 : index
    %c0_7 = arith.constant 0 : index
    %9 = vector.load %arg4[%c0_6, %c0_7] : memref<128x128xbf16, #tpu.memory_space<vmem>>, vector<128x128xbf16>
    %cst_8 = arith.constant dense<0.000000e+00> : vector<128x128xf32>
    %10 = tpu.matmul %8, %9, %cst_8 {dimension_numbers = #tpu.dot_dimension_numbers<[1], [0], [0], [1], [0, 0, 1, 1], [], []>} : vector<128x128xbf16>, vector<128x128xbf16>, vector<128x128xf32> -> vector<128x128xf32>
    %c0_9 = arith.constant 0 : index
    %c0_10 = arith.constant 0 : index
    %11 = vector.load %arg5[%c0_9, %c0_10] : memref<1x128xf32, #tpu.memory_space<vmem>>, vector<1x128xf32>
    %12 = vector.broadcast %11 : vector<1x128xf32> to vector<128x128xf32>
    %13 = arith.addf %10, %12 : vector<128x128xf32>
    %cst_11 = arith.constant 0.000000e+00 : f32
    %14 = vector.broadcast %cst_11 : f32 to vector<128x128xf32>
    %15 = arith.maximumf %13, %14 : vector<128x128xf32>
    %16 = arith.truncf %15 : vector<128x128xf32> to vector<128x128xbf16>
    %c0_12 = arith.constant 0 : index
    %c0_13 = arith.constant 0 : index
    %17 = vector.load %arg6[%c0_12, %c0_13] : memref<128x128xbf16, #tpu.memory_space<vmem>>, vector<128x128xbf16>
    %cst_14 = arith.constant dense<0.000000e+00> : vector<128x128xf32>
    %18 = tpu.matmul %16, %17, %cst_14 {dimension_numbers = #tpu.dot_dimension_numbers<[1], [0], [0], [1], [0, 0, 1, 1], [], []>} : vector<128x128xbf16>, vector<128x128xbf16>, vector<128x128xf32> -> vector<128x128xf32>
    %c0_15 = arith.constant 0 : index
    %c0_16 = arith.constant 0 : index
    %19 = vector.load %arg7[%c0_15, %c0_16] : memref<1x128xf32, #tpu.memory_space<vmem>>, vector<1x128xf32>
    %20 = vector.broadcast %19 : vector<1x128xf32> to vector<128x128xf32>
    %21 = arith.addf %18, %20 : vector<128x128xf32>
    %cst_17 = arith.constant 0.000000e+00 : f32
    %22 = vector.broadcast %cst_17 : f32 to vector<128x128xf32>
    %23 = arith.maximumf %21, %22 : vector<128x128xf32>
    %24 = arith.truncf %23 : vector<128x128xf32> to vector<128x128xbf16>
    %c0_18 = arith.constant 0 : index
    %c0_19 = arith.constant 0 : index
    %25 = vector.load %arg8[%c0_18, %c0_19] : memref<128x128xbf16, #tpu.memory_space<vmem>>, vector<128x128xbf16>
    %cst_20 = arith.constant dense<0.000000e+00> : vector<128x128xf32>
    %26 = tpu.matmul %24, %25, %cst_20 {dimension_numbers = #tpu.dot_dimension_numbers<[1], [0], [0], [1], [0, 0, 1, 1], [], []>} : vector<128x128xbf16>, vector<128x128xbf16>, vector<128x128xf32> -> vector<128x128xf32>
    %c0_21 = arith.constant 0 : index
    %c0_22 = arith.constant 0 : index
    %27 = vector.load %arg9[%c0_21, %c0_22] : memref<1x128xf32, #tpu.memory_space<vmem>>, vector<1x128xf32>
    %28 = vector.broadcast %27 : vector<1x128xf32> to vector<128x128xf32>
    %29 = arith.addf %26, %28 : vector<128x128xf32>
    %cst_23 = arith.constant 0.000000e+00 : f32
    %30 = vector.broadcast %cst_23 : f32 to vector<128x128xf32>
    %31 = arith.maximumf %29, %30 : vector<128x128xf32>
    %32 = arith.truncf %31 : vector<128x128xf32> to vector<128x128xbf16>
    %c0_24 = arith.constant 0 : index
    %c0_25 = arith.constant 0 : index
    %33 = vector.load %arg10[%c0_24, %c0_25] : memref<128x128xbf16, #tpu.memory_space<vmem>>, vector<128x128xbf16>
    %cst_26 = arith.constant dense<0.000000e+00> : vector<128x128xf32>
    %34 = tpu.matmul %32, %33, %cst_26 {dimension_numbers = #tpu.dot_dimension_numbers<[1], [0], [0], [1], [0, 0, 1, 1], [], []>} : vector<128x128xbf16>, vector<128x128xbf16>, vector<128x128xf32> -> vector<128x128xf32>
    %c0_27 = arith.constant 0 : index
    %c0_28 = arith.constant 0 : index
    %35 = vector.load %arg11[%c0_27, %c0_28] : memref<1x128xf32, #tpu.memory_space<vmem>>, vector<1x128xf32>
    %36 = vector.broadcast %35 : vector<1x128xf32> to vector<128x128xf32>
    %37 = arith.addf %34, %36 : vector<128x128xf32>
    %38 = arith.truncf %37 : vector<128x128xf32> to vector<128x128xbf16>
    %c0_29 = arith.constant 0 : index
    %c0_30 = arith.constant 0 : index
    %39 = vector.load %arg12[%c0_29, %c0_30] : memref<128x128xbf16, #tpu.memory_space<vmem>>, vector<128x128xbf16>
    %cst_31 = arith.constant dense<0.000000e+00> : vector<128x128xf32>
    %40 = tpu.matmul %38, %39, %cst_31 {dimension_numbers = #tpu.dot_dimension_numbers<[1], [0], [0], [1], [0, 0, 1, 1], [], []>} : vector<128x128xbf16>, vector<128x128xbf16>, vector<128x128xf32> -> vector<128x128xf32>
    %c0_32 = arith.constant 0 : index
    %c0_33 = arith.constant 0 : index
    %41 = vector.load %arg13[%c0_32, %c0_33] : memref<1x128xf32, #tpu.memory_space<vmem>>, vector<1x128xf32>
    %42 = vector.broadcast %41 : vector<1x128xf32> to vector<128x128xf32>
    %43 = arith.addf %40, %42 : vector<128x128xf32>
    %c0_34 = arith.constant 0 : index
    %c0_35 = arith.constant 0 : index
    %44 = vector.load %arg14[%c0_34, %c0_35] : memref<128x128xf32, #tpu.memory_space<vmem>>, vector<128x128xf32>
    tpu.vector_store %arg14[%c0_34, %c0_35], %43 {strides = array<i32>} : memref<128x128xf32, #tpu.memory_space<vmem>>, vector<128x128xf32>,
    return
  }
  func.func @transform_0(%arg0: i32) -> (i32, i32) {
    %c0_i32 = arith.constant 0 : i32
    %c0_i32_0 = arith.constant 0 : i32
    return %arg0, %c0_i32 : i32, i32
  }
  func.func @transform_1(%arg0: i32) -> (i32, i32) {
    %c0_i32 = arith.constant 0 : i32
    %c0_i32_0 = arith.constant 0 : i32
    %c0_i32_1 = arith.constant 0 : i32
    return %c0_i32, %c0_i32_0 : i32, i32
  }
  func.func @transform_2(%arg0: i32) -> (i32, i32) {
    %c0_i32 = arith.constant 0 : i32
    %c0_i32_0 = arith.constant 0 : i32
    %c0_i32_1 = arith.constant 0 : i32
    return %c0_i32, %c0_i32_0 : i32, i32
  }
  func.func @transform_3(%arg0: i32) -> (i32, i32) {
    %c0_i32 = arith.constant 0 : i32
    %c0_i32_0 = arith.constant 0 : i32
    %c0_i32_1 = arith.constant 0 : i32
    return %c0_i32, %c0_i32_0 : i32, i32
  }
  func.func @transform_4(%arg0: i32) -> (i32, i32) {
    %c0_i32 = arith.constant 0 : i32
    %c0_i32_0 = arith.constant 0 : i32
    %c0_i32_1 = arith.constant 0 : i32
    return %c0_i32, %c0_i32_0 : i32, i32
  }
  func.func @transform_5(%arg0: i32) -> (i32, i32) {
    %c0_i32 = arith.constant 0 : i32
    %c0_i32_0 = arith.constant 0 : i32
    %c0_i32_1 = arith.constant 0 : i32
    return %c0_i32, %c0_i32_0 : i32, i32
  }
  func.func @transform_6(%arg0: i32) -> (i32, i32) {
    %c0_i32 = arith.constant 0 : i32
    %c0_i32_0 = arith.constant 0 : i32
    %c0_i32_1 = arith.constant 0 : i32
    return %c0_i32, %c0_i32_0 : i32, i32
  }
  func.func @transform_7(%arg0: i32) -> (i32, i32) {
    %c0_i32 = arith.constant 0 : i32
    %c0_i32_0 = arith.constant 0 : i32
    %c0_i32_1 = arith.constant 0 : i32
    return %c0_i32, %c0_i32_0 : i32, i32
  }
  func.func @transform_8(%arg0: i32) -> (i32, i32) {
    %c0_i32 = arith.constant 0 : i32
    %c0_i32_0 = arith.constant 0 : i32
    %c0_i32_1 = arith.constant 0 : i32
    return %c0_i32, %c0_i32_0 : i32, i32
  }
  func.func @transform_9(%arg0: i32) -> (i32, i32) {
    %c0_i32 = arith.constant 0 : i32
    %c0_i32_0 = arith.constant 0 : i32
    %c0_i32_1 = arith.constant 0 : i32
    return %c0_i32, %c0_i32_0 : i32, i32
  }
  func.func @transform_10(%arg0: i32) -> (i32, i32) {
    %c0_i32 = arith.constant 0 : i32
    %c0_i32_0 = arith.constant 0 : i32
    %c0_i32_1 = arith.constant 0 : i32
    return %c0_i32, %c0_i32_0 : i32, i32
  }
  func.func @transform_11(%arg0: i32) -> (i32, i32) {
    %c0_i32 = arith.constant 0 : i32
    %c0_i32_0 = arith.constant 0 : i32
    %c0_i32_1 = arith.constant 0 : i32
    return %c0_i32, %c0_i32_0 : i32, i32
  }
  func.func @transform_12(%arg0: i32) -> (i32, i32) {
    %c0_i32 = arith.constant 0 : i32
    %c0_i32_0 = arith.constant 0 : i32
    %c0_i32_1 = arith.constant 0 : i32
    return %c0_i32, %c0_i32_0 : i32, i32
  }
  func.func @transform_13(%arg0: i32) -> (i32, i32) {
    %c0_i32 = arith.constant 0 : i32
    %c0_i32_0 = arith.constant 0 : i32
    return %arg0, %c0_i32 : i32, i32
  }
}

</mosaic_0001>

<bundles_post_ra>
// kernel: tpu_custom_call.1
= control target key start
LH: loop header
LB: loop body
LE: loop exit
PB: predicated region body
PF: predicated region fallthrough
CT: control target
= control target key end

     0   :  { %s2869_s0 = inlined_call_operand.vmem [shape: bf16[512,16], index: 0, kind: input, shape index: {}]   ;;  %s2870_s1 = inlined_call_operand.hbm [shape: bf16[16,128], index: 1, kind: input, shape index: {}]   ;;  %s2871_s2 = inlined_call_operand.vmem [shape: f32[1,128], index: 2, kind: input, shape index: {}]   ;;  %s2872_s3 = inlined_call_operand.vmem [shape: bf16[128,128], index: 3, kind: input, shape index: {}]   ;;  %s2873_s4 = inlined_call_operand.vmem [shape: f32[1,128], index: 4, kind: input, shape index: {}]   ;;  %s2874_s5 = inlined_call_operand.vmem [shape: bf16[128,128], index: 5, kind: input, shape index: {}]   ;;  %s2875_s6 = inlined_call_operand.hbm [shape: f32[1,128], index: 6, kind: input, shape index: {}]   ;;  %s2876_s7 = inlined_call_operand.vmem [shape: bf16[128,128], index: 7, kind: input, shape index: {}]   ;;  %s2877_s8 = inlined_call_operand.hbm [shape: f32[1,128], index: 8, kind: input, shape index: {}]   ;;  %s2878_s9 = inlined_call_operand.vmem [shape: bf16[128,128], index: 9, kind: input, shape index: {}]   ;;  %s2879_s10 = inlined_call_operand.vmem [shape: f32[1,128], index: 10, kind: input, shape index: {}]   ;;  %s2880_s11 = inlined_call_operand.vmem [shape: bf16[128,128], index: 11, kind: input, shape index: {}]   ;;  %s2881_s12 = inlined_call_operand.vmem [shape: f32[1,128], index: 12, kind: input, shape index: {}]   ;;  %s2882_s13 = inlined_call_operand.hbm [shape: f32[512,128], index: 13, kind: output, shape index: {}]  }
   0x1   :  { %2893 = sst [smem:[#allocation18_spill]] %s2875_s6 }
   0x2   :  { %2894 = sst [smem:[#allocation19_spill]] %s2882_s13 }
   0x3   :  { %18 = vsyncpa [#allocation3], 0 }
   0x4   :  { %19 = vsyncpa [#allocation6], 0 }
   0x5   :  { %20 = vsyncpa [#allocation4], 0 }
   0x6   :  { %22 = vsyncpa [#allocation4 + $0x1], 0  ;;  %s2465_s25 = smov 0   ;;  %s2467_s26 = smov 0  }
   0x7   :  { %s2469_s27 = smov 0   ;;  %s2471_s28 = smov 0  }
   0x8 LB: > { %2895 = sst [smem:[#allocation12_spill]] %s2373_s25  ;;  %s2486_s29 = sadd.s32 4294967295, %s2385_s28   ;;  %s2385_s28 = sphi %s2471_s28, %s2918_s28   ;;  %s2381_s27 = sphi %s2469_s27, %s2920_s27   ;;  %s2377_s26 = sphi %s2467_s26, %s2922_s26   ;;  %s2373_s25 = sphi %s2465_s25, %s2921_s25  }
   0x9   : > { %2896 = sst [smem:[#allocation13_spill]] %s2381_s27  ;;  %s1743_s30 = sadd.s32 4294967294, %s2385_s28  }
   0xa   : > { %2897 = sst [smem:[#allocation14_spill]] %s2385_s28  ;;  %s2490_s14 = sadd.s32 1, %s2385_s28  }
   0xb   : > { %2898 = sst [smem:[#allocation15_spill]] %s2490_s14  ;;  %s313_s15 = sadd.s32 1, %s2381_s27 }
   0xc   : > { %s310_s16 = ssub.s32 %s2385_s28, %s2490_s14  ;;  %p323_p0 = scmp.ne.s32.totalorder %s2381_s27, %s2377_s26 }
   0xd   : > { %p311_p1 = scmp.eq.s32.totalorder %s310_s16, 0  ;;  %p324_p2 = scmp.eq.s32.totalorder %s2486_s29, 3 }
   0xe   : > { %p329_p3 = scmp.ne.s32.totalorder %s2377_s26, %s2373_s25  ;;  %p330_p4 = scmp.eq.s32.totalorder %s1743_s30, 3 }
   0xf   : > { %s2501_s17 = scalar_select %p311_p1, %s2381_s27, %s313_s15  }
  0x10   : > { %p2503_p5 = por %p324_p2, %p323_p0  ;;  %p2507_p6 = por %p330_p4, %p329_p3 }
  0x11   : > { %2899 = sst [smem:[#allocation16_spill]] %s2501_s17  ;;  %p1744_p7 = scmp.ge.s32.totalorder %s2385_s28, 1 }
  0x12   : > { %s2900_s18 = scalar_select %p2503_p5, 1, 0 }
  0x13   : > { %s2901_s19 = scalar_select %p2507_p6, 1, 0 }
  0x14   : > { %p337_p8 = scmp.lt.s32.totalorder %s2385_s28, 5  ;;  %p2888_p9 = scmp.eq.s32.totalorder %s2486_s29, 0 }
  0x15   : > { %2902 = sst [smem:[#allocation17_spill]] %s2901_s19  ;;  %s2387_s21 = smov [#allocation5]  }
  0x16   : > { %p2514_p10 = pnand %p1744_p7, %p337_p8  ;;  %s375_s22 = sshll.u32 %s2387_s21, 4  ;;  %s376_s22 = int_to_ptr.vmem [resolvable:$true] %s375_s22 }
  0x17   : > { %s2388_s23 = smov [#allocation2]   ;;  %s2389_s15 = smov [#allocation7]  }
  0x18   : > { %s2903_s20 = scalar_select %p2514_p10, 1, 0 }
  0x19   : > { %p2122_p11 = pneg %p2514_p10  ;;  %s349_s24 = sshll.u32 %s2388_s23, 4  ;;  %s2526_s24 = int_to_ptr.vmem [resolvable:$true] %s349_s24 }
  0x1a   : > { %s2528_s16 = sshll.u32 %s2389_s15, 4  ;;  %s2905_s6 = sld [smem:[#allocation18_spill]]  ;;  %s390_s16 = int_to_ptr.vmem [resolvable:$true] %s2528_s16 }
  0x1b   : > { %p2522_p12 = pnand %p2888_p9, %p2122_p11 }
  0x1d   : > { %p2538_p0 = pneg %p2522_p12 }
  0x20   : > { %s2231_s21 = scalar_lea.hbm %s2905_s6, 16 }
  0x21   : > { %p2232_p13 = scmp.ne.s32.totalorder %s2905_s6, %s2231_s21  ;;  %p2238_p3 = scmp.lt.u32.totalorder %s2231_s21, %s2905_s6 }
  0x23   : > { %p2234_p1 = pnand %p2538_p0, %p2232_p13 }
  0x25   : > { %p2235_p2 = pneg %p2234_p1 }
  0x27   : > { %p2240_p4 = pnand %p2238_p3, %p2235_p2 }
  0x29   : > { %2243 = shalt.err (!%p2240_p4)
}
  0x2a   : > { %s2244_s27 = scalar_lea.vmem %s376_s22, 16  ;;  %s2251_s14 = scalar_lea.vmem %s376_s22, 32 }
  0x2b   : > { %p2245_p7 = scmp.ne.s32.totalorder %s376_s22, %s2244_s27  ;;  %p2252_p9 = scmp.lt.s32.totalorder %s376_s22, %s376_s22 }
  0x2c   : > { %p2253_p6 = scmp.lt.s32.totalorder %s2251_s14, %s2244_s27 }
  0x2d   : > { %p2247_p8 = pnand %p2245_p7, %p2538_p0 }
  0x2e   : > { %p2254_p5 = por %p2253_p6, %p2252_p9 }
  0x2f   : > { %p2248_p11 = pneg %p2247_p8 }
  0x31   : > { %p2255_p10 = pnand %p2254_p5, %p2248_p11 }
  0x33   : > { %2258 = shalt.err (!%p2255_p10)
}
  0x34   : > { %2128 = dma.hbm_to_vmem [thread:$0]  (!%p2522_p12), %s2905_s6, 16, %s376_s22, [#allocation6]  }
  0x35   : > { %s2259_s15 = scalar_lea.hbm %s2870_s1, 128 }
  0x36   : > { %p2260_p13 = scmp.ne.s32.totalorder %s2870_s1, %s2259_s15  ;;  %p2266_p5 = scmp.lt.u32.totalorder %s2259_s15, %s2870_s1 }
  0x38   : > { %p2262_p1 = pnand %p2260_p13, %p2538_p0 }
  0x3a   : > { %p2263_p6 = pneg %p2262_p1 }
  0x3c   : > { %p2268_p9 = pnand %p2266_p5, %p2263_p6 }
  0x3e   : > { %2271 = shalt.err (!%p2268_p9)
}
  0x3f   : > { %s2272_s22 = scalar_lea.vmem %s2526_s24, 128  ;;  %p2280_p4 = scmp.lt.s32.totalorder %s2526_s24, %s2526_s24 }
  0x40   : > { %p2273_p10 = scmp.ne.s32.totalorder %s2526_s24, %s2272_s22  ;;  %p2281_p7 = scmp.lt.s32.totalorder %s2272_s22, %s2272_s22 }
  0x42   : > { %p2275_p2 = pnand %p2273_p10, %p2538_p0  ;;  %p2282_p8 = por %p2281_p7, %p2280_p4 }
  0x44   : > { %p2276_p3 = pneg %p2275_p2 }
  0x46   : > { %p2283_p11 = pnand %p2282_p8, %p2276_p3 }
  0x48   : > { %2286 = shalt.err (!%p2283_p11)
}
  0x49   : > { %s2390_s13 = smov 64   ;;  %s2391_s28 = smov 4  }
  0x4a   : > { %2125 = dma.hbm_to_vmem [thread:$0]  (!%p2522_p12), %s2870_s1, 128, %s2526_s24, [#allocation3], %s2390_s13, %s2390_s13, %s2391_s28  }
  0x4b   : > { %s2287_s15 = scalar_lea.hbm %s2877_s8, 16 }
  0x4c   : > { %p2288_p13 = scmp.ne.s32.totalorder %s2877_s8, %s2287_s15  ;;  %p2294_p5 = scmp.lt.u32.totalorder %s2287_s15, %s2877_s8 }
  0x4e   : > { %p2290_p1 = pnand %p2288_p13, %p2538_p0 }
  0x50   : > { %p2291_p6 = pneg %p2290_p1 }
  0x52   : > { %p2296_p9 = pnand %p2294_p5, %p2291_p6 }
  0x54   : > { %2299 = shalt.err (!%p2296_p9)
}
  0x55   : > { %s2300_s17 = scalar_lea.vmem %s390_s16, 16  ;;  %s2307_s24 = scalar_lea.vmem %s390_s16, 32 }
  0x56   : > { %p2301_p10 = scmp.ne.s32.totalorder %s390_s16, %s2300_s17  ;;  %p2308_p4 = scmp.lt.s32.totalorder %s390_s16, %s390_s16 }
  0x57   : > { %p2309_p7 = scmp.lt.s32.totalorder %s2307_s24, %s2300_s17 }
  0x58   : > { %p2303_p2 = pnand %p2301_p10, %p2538_p0 }
  0x59   : > { %p2310_p8 = por %p2309_p7, %p2308_p4 }
  0x5a   : > { %p2304_p3 = pneg %p2303_p2 }
  0x5c   : > { %p2311_p11 = pnand %p2310_p8, %p2304_p3 }
  0x5e   : > { %2314 = shalt.err (!%p2311_p11)
}
  0x5f   : > { %2131 = dma.hbm_to_vmem [thread:$0]  (!%p2522_p12), %s2877_s8, 16, %s390_s16, [#allocation6]  }
  0x60   : > { %p2907_p13 = scmp.ne.s32.totalorder %s2903_s20, 0 }
  0x61   : > { %p2908_p1 = scmp.eq.s32.totalorder (!%p2907_p13), %s2486_s29, 0 }
  0x62   : > { %423 = sbr.rel (%p2907_p13) target bundleno = 1482 (0x5ca), region = 72 }
  0x69   : > { %2360 = dma.done.wait (%p2908_p1), [#allocation3], 128   ;;  %p2909_p0 = pmov %p2908_p1 }
  0x6b   : > { %2362 = vsyncadd (%p2909_p0), [#allocation3], 4294967168  ;;  %p2910_p6 = pmov %p2909_p0 }
  0x6c   : > { %p2911_p5 = pmov %p2909_p0 }
  0x6d   : > { %2364 = dma.done.wait (%p2910_p6), [#allocation6], 32  }
  0x6e   : > { %2366 = vsyncadd (%p2911_p5), [#allocation6], 4294967264  ;;  %s1754_s6 = sshll.u32 %s2486_s29, 4  ;;  %v2182_v0 = vld [vmem:[#allocation2] sm:$0xff]   ;;  %vm554_vm0 = vcmask 130048   ;;  %v2192_v6 = vld [vmem:[%s2872_s3 + $0x8] sm:$0xff]  }
  0x6f   : > { %p476_p9 = scmp.lt.s32.totalorder %s1754_s6, 63  ;;  %1914 = vmatprep.subr.bf16.mxu0 %v2182_v0  ;;  %v2191_v5 = vld [vmem:[%s2872_s3] sm:$0xff]   ;;  %v2193_v8 = vld [vmem:[%s2872_s3 + $0x10] sm:$0xff]   ;;  %v2194_v9 = vld [vmem:[%s2872_s3 + $0x18] sm:$0xff]   ;;  %s472_s22 = sand.u32 1, %s2377_s26  }
  0x70   : > { %1915 = vmatpush3.bf16.msra.mxu0 %v2182_v0  ;;  %1932 = vmatprep.subr.bf16.mxu1 %v2191_v5  ;;  %v2195_v12 = vld [vmem:[%s2872_s3 + $0x20] sm:$0xff]   ;;  %v2196_v13 = vld [vmem:[%s2872_s3 + $0x28] sm:$0xff]   ;;  %v2197_v15 = vld [vmem:[%s2872_s3 + $0x30] sm:$0xff]   ;;  %s1753_s17 = sshll.u32 %s472_s22, 7  ;;  %s2912_s19 = sld [smem:[#allocation19_spill]] }
  0x71   : > { %s2924_s6 = smov (!%p476_p9, %s1754_s6), 63  ;;  %1933 = vmatpush3.bf16.msra.mxu1 %v2191_v5  ;;  %v2198_v16 = vld [vmem:[%s2872_s3 + $0x38] sm:$0xff]   ;;  %v2199_v17 = vld [vmem:[%s2874_s5] sm:$0xff]   ;;  %v2200_v18 = vld [vmem:[%s2874_s5 + $0x8] sm:$0xff]   ;;  %s2799_s28 = scalar_lea.vmem [#allocation8], %s1753_s17 }
  0x72   : > { %s1755_s30 = sshll.u32 %s2924_s6, 2  ;;  %1934 = vmatprep.subr.bf16.mxu1 %v2192_v6  ;;  %1964 = vmatprep.subr.bf16.mxu0 %v2199_v17  ;;  %v2201_v19 = vld [vmem:[%s2874_s5 + $0x10] sm:$0xff]   ;;  %v2202_v20 = vld [vmem:[%s2874_s5 + $0x18] sm:$0xff]   ;;  %v2203_v21 = vld [vmem:[%s2874_s5 + $0x20] sm:$0xff]   ;;  %s1824_s6 = sshll.u32 %s2486_s29, 11 }
  0x73   : > { %s2610_s23 = scalar_lea.vmem %s2869_s0, %s1755_s30  ;;  %v2204_v22 = vld [vmem:[%s2874_s5 + $0x28] sm:$0xff]   ;;  %v1756_v23 = vld [vmem:[%s2871_s2] ss:$0 sm:$0xff]  ;;  %s1650_s30 = sshll.u32 %s2799_s28, 4  ;;  %s2821_s30 = int_to_ptr.vmem [resolvable:$true] %s1650_s30 }
  0x74   : > { %v2183_v1 = vld [vmem:[%s2610_s23] sm:$0xff]   ;;  %v2184_v2 = vld [vmem:[%s2610_s23 + $0x8] sm:$0xff]   ;;  %v2185_v3 = vld [vmem:[%s2610_s23 + $0x10] sm:$0xff]   ;;  %s2828_s29 = scalar_lea.sflag [#allocation4], %s472_s22  ;;  %s2315_s25 = scalar_lea.vmem %s2821_s30, 2048 }
  0x75   : > { %1916 = vmatprep.mubr.msk.bf16.mxu0 %vm554_vm0, %v2183_v1  ;;  %v2186_v4 = vld [vmem:[%s2610_s23 + $0x18] sm:$0xff]   ;;  %v2187_v7 = vld [vmem:[%s2610_s23 + $0x20] sm:$0xff]   ;;  %v2188_v10 = vld [vmem:[%s2610_s23 + $0x28] sm:$0xff]   ;;  %1935 = vmatpush3.bf16.msra.mxu1 %v2192_v6  ;;  %p2316_p12 = scmp.ne.s32.totalorder %s2821_s30, %s2315_s25  ;;  %p2913_p10 = scmp.ne.s32.totalorder %s2900_s18, 0 }
  0x76   : > { %1917 = vmatmul.mubr.msk.bf16.vlgmr.msra.gmra.mrb[0].mxu0 %vm554_vm0, %v2184_v2  ;;  %v2189_v11 = vld [vmem:[%s2610_s23 + $0x30] sm:$0xff]   ;;  %1936 = vmatprep.subr.bf16.mxu1 %v2193_v8  ;;  %v2190_v14 = vld [vmem:[%s2610_s23 + $0x38] sm:$0xff]   ;;  %s2819_s23 = scalar_lea.hbm %s2912_s19, %s1824_s6  ;;  %s2392_s21 = smov [#allocation8]  }
  0x77   : > { %1920 = vmatprep.mubr.msk.bf16.mxu0 %vm554_vm0, %v2185_v3  ;;  %1965 = vmatpush3.bf16.msra.mxu0 %v2199_v17  ;;  %v2206_v17 = vld [vmem:[%s2874_s5 + $0x38] sm:$0xff]   ;;  %p2317_p2 = pnand %p2316_p12, %p2913_p10  ;;  %s2319_s15 = sshll.u32 %s2392_s21, 4  ;;  %s2320_s15 = int_to_ptr.vmem [resolvable:$false] %s2319_s15 }
  0x78   : > { %1966 = vmatprep.subr.bf16.mxu0 %v2200_v18  ;;  %s2321_s27 = scalar_lea.vmem %s2320_s15, 4096  ;;  %p2322_p4 = scmp.lt.s32.totalorder %s2821_s30, %s2320_s15 }
  0x79   : > { %1937 = vmatpush3.bf16.msra.mxu1 %v2193_v8  ;;  %p2318_p3 = pneg %p2317_p2  ;;  %p2323_p7 = scmp.lt.s32.totalorder %s2321_s27, %s2315_s25 }
  0x7a   : > { %1938 = vmatprep.subr.bf16.mxu1 %v2194_v9 }
  0x7b   : > { %1967 = vmatpush3.bf16.msra.mxu0 %v2200_v18  ;;  %v2207_v18 = vld [vmem:[%s2876_s7] sm:$0xff]   ;;  %p2324_p8 = por %p2323_p7, %p2322_p4 }
  0x7c   : > { %1968 = vmatprep.subr.bf16.mxu0 %v2201_v19 }
  0x7d   : > { %1939 = vmatpush3.bf16.msra.mxu1 %v2194_v9  ;;  %p2325_p11 = pnand %p2324_p8, %p2318_p3 }
  0x7e   : > { %1921 = vmatmul.mubr.msk.bf16.gmra.mrb[4].mxu0 %vm554_vm0, %v2186_v4  ;;  %1940 = vmatprep.subr.bf16.mxu1 %v2195_v12 }
  0x7f   : > { %1924 = vmatprep.mubr.msk.bf16.mxu0 %vm554_vm0, %v2187_v7  ;;  %1969 = vmatpush3.bf16.msra.mxu0 %v2201_v19  ;;  %v2208_v19 = vld [vmem:[%s2876_s7 + $0x8] sm:$0xff]  }
  0x80   : > { %1970 = vmatprep.subr.bf16.mxu0 %v2202_v20 }
  0x81   : > { %1941 = vmatpush3.bf16.msra.mxu1 %v2195_v12 }
  0x82   : > { %1942 = vmatprep.subr.bf16.mxu1 %v2196_v13 }
  0x83   : > { %1971 = vmatpush3.bf16.msra.mxu0 %v2202_v20  ;;  %v2209_v20 = vld [vmem:[%s2876_s7 + $0x10] sm:$0xff]  }
  0x84   : > { %1972 = vmatprep.subr.bf16.mxu0 %v2203_v21 }
  0x85   : > { %1943 = vmatpush3.bf16.msra.mxu1 %v2196_v13 }
  0x86   : > { %1925 = vmatmul.mubr.msk.bf16.gmra.mrb[8].mxu0 %vm554_vm0, %v2188_v10  ;;  %1944 = vmatprep.subr.bf16.mxu1 %v2197_v15 }
  0x87   : > { %1928 = vmatprep.mubr.msk.bf16.mxu0 %vm554_vm0, %v2189_v11  ;;  %1973 = vmatpush3.bf16.msra.mxu0 %v2203_v21  ;;  %v2210_v21 = vld [vmem:[%s2876_s7 + $0x18] sm:$0xff]  }
  0x88   : > { %1974 = vmatprep.subr.bf16.mxu0 %v2204_v22 }
  0x89   : > { %1945 = vmatpush3.bf16.msra.mxu1 %v2197_v15 }
  0x8a   : > { %1946 = vmatprep.subr.bf16.mxu1 %v2198_v16 }
  0x8b   : > { %1975 = vmatpush3.bf16.msra.mxu0 %v2204_v22  ;;  %v2211_v22 = vld [vmem:[%s2876_s7 + $0x20] sm:$0xff]  }
  0x8d   : > { %1947 = vmatpush3.bf16.msra.mxu1 %v2198_v16  ;;  %v2205_v16 = vld [vmem:[%s2874_s5 + $0x30] sm:$0xff]  }
  0x8e   : > { %1929 = vmatmul.mubr.msk.bf16.gmra.mrb[12].mxu0 %vm554_vm0, %v2190_v14  ;;  %1976 = vmatprep.subr.bf16.mxu0 %v2205_v16 }
  0x8f   : > { %1977 = vmatpush3.bf16.msra.mxu0 %v2205_v16  ;;  %1996 = vmatprep.subr.bf16.mxu1 %v2207_v18 }
  0x90   : > { %1978 = vmatprep.subr.bf16.mxu0 %v2206_v17 }
  0x93   : > { %1979 = vmatpush3.bf16.msra.mxu0 %v2206_v17  ;;  %v2213_v17 = vld [vmem:[%s2876_s7 + $0x30] sm:$0xff]  }
 0x149   : > { %v1918_v24 = vpop.f32.mrb[0].mxu0 }
 0x14a   : > { %v622_v25 = vadd.f32 %v1918_v24, %v1756_v23  ;;  %v613_v26 = vpop.f32.mrb[1].mxu0  ;;  %v1774_v24 = vld [vmem:[%s2873_s4] ss:$0 sm:$0xff] }
 0x14b   : > { %v614_v27 = vadd.f32 %v1756_v23, %v613_v26  ;;  %v1919_v28 = vpop.f32.mrb[2].mxu0 }
 0x14c   : > { %v625_v29 = vadd.f32 %v1919_v28, %v1756_v23  ;;  %v616_v30 = vpop.f32.mrb[3].mxu0  ;;  %v678_v32 = vmax.f32 %v622_v25, 0.0 }
 0x14d   : > { %v617_v31 = vadd.f32 %v1756_v23, %v616_v30  ;;  %v676_v34 = vmax.f32 %v614_v27, 0.0 }
 0x14e   : > { %v679_v33 = vmax.f32 %v625_v29, 0.0 }
 0x14f   : > { %v677_v35 = vmax.f32 %v617_v31, 0.0 }
 0x150   : > { %v693_v36 = vpack.c.bf16 %v679_v33, %v678_v32 }
 0x151   : > { %v1922_v37 = vpop.f32.mrb[4].mxu0  ;;  %v692_v38 = vpack.c.bf16 %v677_v35, %v676_v34 }
 0x152   : > { %v638_v39 = vadd.f32 %v1922_v37, %v1756_v23  ;;  %v629_v40 = vpop.f32.mrb[5].mxu0 }
 0x153   : > { %v630_v41 = vadd.f32 %v1756_v23, %v629_v40  ;;  %v1923_v42 = vpop.f32.mrb[6].mxu0  ;;  %1948 = vmatprep.mubr.bf16.mxu1 %v692_v38 }
 0x154   : > { %v641_v43 = vadd.f32 %v1923_v42, %v1756_v23  ;;  %v632_v44 = vpop.f32.mrb[7].mxu0  ;;  %1949 = vmatmul.mubr.bf16.vlgmr.msra.gmra.mrb[0].mxu1 %v693_v36  ;;  %v682_v46 = vmax.f32 %v638_v39, 0.0 }
 0x155   : > { %v633_v45 = vadd.f32 %v1756_v23, %v632_v44  ;;  %v680_v48 = vmax.f32 %v630_v41, 0.0  ;;  %1997 = vmatpush3.bf16.msra.mxu1 %v2207_v18  ;;  %v2214_v18 = vld [vmem:[%s2876_s7 + $0x38] sm:$0xff]  }
 0x156   : > { %v683_v47 = vmax.f32 %v641_v43, 0.0  ;;  %1998 = vmatprep.subr.bf16.mxu1 %v2208_v19 }
 0x157   : > { %v681_v49 = vmax.f32 %v633_v45, 0.0 }
 0x158   : > { %v695_v50 = vpack.c.bf16 %v683_v47, %v682_v46 }
 0x159   : > { %v694_v51 = vpack.c.bf16 %v681_v49, %v680_v48  ;;  %v1926_v52 = vpop.f32.mrb[8].mxu0  ;;  %1999 = vmatpush3.bf16.msra.mxu1 %v2208_v19  ;;  %v2215_v19 = vld [vmem:[%s2878_s9] sm:$0xff]  }
 0x15a   : > { %v654_v53 = vadd.f32 %v1926_v52, %v1756_v23  ;;  %v645_v54 = vpop.f32.mrb[9].mxu0  ;;  %2000 = vmatprep.subr.bf16.mxu1 %v2209_v20  ;;  %2028 = vmatprep.subr.bf16.mxu0 %v2215_v19 }
 0x15b   : > { %v646_v55 = vadd.f32 %v1756_v23, %v645_v54  ;;  %v1927_v56 = vpop.f32.mrb[10].mxu0  ;;  %1952 = vmatprep.mubr.bf16.mxu1 %v694_v51 }
 0x15c   : > { %v657_v57 = vadd.f32 %v1927_v56, %v1756_v23  ;;  %v648_v58 = vpop.f32.mrb[11].mxu0  ;;  %1953 = vmatmul.mubr.bf16.gmra.mrb[4].mxu1 %v695_v50  ;;  %v686_v60 = vmax.f32 %v654_v53, 0.0 }
 0x15d   : > { %v649_v59 = vadd.f32 %v1756_v23, %v648_v58  ;;  %v684_v62 = vmax.f32 %v646_v55, 0.0  ;;  %2001 = vmatpush3.bf16.msra.mxu1 %v2209_v20  ;;  %v2216_v20 = vld [vmem:[%s2878_s9 + $0x8] sm:$0xff]  }
 0x15e   : > { %v687_v61 = vmax.f32 %v657_v57, 0.0  ;;  %2002 = vmatprep.subr.bf16.mxu1 %v2210_v21 }
 0x15f   : > { %v685_v63 = vmax.f32 %v649_v59, 0.0 }
 0x160   : > { %v697_v0 = vpack.c.bf16 %v687_v61, %v686_v60 }
 0x161   : > { %v696_v1 = vpack.c.bf16 %v685_v63, %v684_v62  ;;  %v1930_v2 = vpop.f32.mrb[12].mxu0  ;;  %2003 = vmatpush3.bf16.msra.mxu1 %v2210_v21  ;;  %v2217_v21 = vld [vmem:[%s2878_s9 + $0x10] sm:$0xff]  }
 0x162   : > { %v670_v3 = vadd.f32 %v1930_v2, %v1756_v23  ;;  %v661_v4 = vpop.f32.mrb[13].mxu0  ;;  %2004 = vmatprep.subr.bf16.mxu1 %v2211_v22 }
 0x163   : > { %v662_v5 = vadd.f32 %v1756_v23, %v661_v4  ;;  %v1931_v6 = vpop.f32.mrb[14].mxu0  ;;  %1956 = vmatprep.mubr.bf16.mxu1 %v696_v1 }
 0x164   : > { %v673_v7 = vadd.f32 %v1931_v6, %v1756_v23  ;;  %v664_v8 = vpop.f32.mrb[15].mxu0  ;;  %1957 = vmatmul.mubr.bf16.gmra.mrb[8].mxu1 %v697_v0  ;;  %v690_v10 = vmax.f32 %v670_v3, 0.0 }
 0x165   : > { %v665_v9 = vadd.f32 %v1756_v23, %v664_v8  ;;  %v688_v12 = vmax.f32 %v662_v5, 0.0  ;;  %v2212_v23 = vld [vmem:[%s2876_s7 + $0x28] sm:$0xff]   ;;  %2005 = vmatpush3.bf16.msra.mxu1 %v2211_v22  ;;  %v2218_v22 = vld [vmem:[%s2878_s9 + $0x18] sm:$0xff]  }
 0x166   : > { %v691_v11 = vmax.f32 %v673_v7, 0.0  ;;  %2006 = vmatprep.subr.bf16.mxu1 %v2212_v23 }
 0x167   : > { %v689_v13 = vmax.f32 %v665_v9, 0.0 }
 0x168   : > { %v699_v14 = vpack.c.bf16 %v691_v11, %v690_v10 }
 0x169   : > { %v698_v15 = vpack.c.bf16 %v689_v13, %v688_v12  ;;  %2007 = vmatpush3.bf16.msra.mxu1 %v2212_v23  ;;  %v2219_v23 = vld [vmem:[%s2878_s9 + $0x20] sm:$0xff]  }
 0x16a   : > { %2008 = vmatprep.subr.bf16.mxu1 %v2213_v17 }
 0x16b   : > { %1960 = vmatprep.mubr.bf16.mxu1 %v698_v15 }
 0x16c   : > { %1961 = vmatmul.mubr.bf16.gmra.mrb[12].mxu1 %v699_v14 }
 0x16d   : > { %2009 = vmatpush3.bf16.msra.mxu1 %v2213_v17 }
 0x16e   : > { %2010 = vmatprep.subr.bf16.mxu1 %v2214_v18 }
 0x171   : > { %2011 = vmatpush3.bf16.msra.mxu1 %v2214_v18  ;;  %v2221_v18 = vld [vmem:[%s2878_s9 + $0x30] sm:$0xff]  }
 0x227   : > { %v1950_v25 = vpop.f32.mrb[0].mxu1 }
 0x228   : > { %v814_v26 = vadd.f32 %v1950_v25, %v1774_v24  ;;  %v805_v27 = vpop.f32.mrb[1].mxu1  ;;  %v1783_v25 = vld [vmem:[#allocation5] ss:$0 sm:$0xff] }
 0x229   : > { %v806_v28 = vadd.f32 %v1774_v24, %v805_v27  ;;  %v1951_v29 = vpop.f32.mrb[2].mxu1 }
 0x22a   : > { %v817_v30 = vadd.f32 %v1951_v29, %v1774_v24  ;;  %v808_v31 = vpop.f32.mrb[3].mxu1  ;;  %v870_v33 = vmax.f32 %v814_v26, 0.0 }
 0x22b   : > { %v809_v32 = vadd.f32 %v1774_v24, %v808_v31  ;;  %v868_v35 = vmax.f32 %v806_v28, 0.0 }
 0x22c   : > { %v871_v34 = vmax.f32 %v817_v30, 0.0 }
 0x22d   : > { %v869_v36 = vmax.f32 %v809_v32, 0.0 }
 0x22e   : > { %v885_v37 = vpack.c.bf16 %v871_v34, %v870_v33 }
 0x22f   : > { %v884_v38 = vpack.c.bf16 %v869_v36, %v868_v35  ;;  %v1954_v39 = vpop.f32.mrb[4].mxu1 }
 0x230   : > { %v830_v40 = vadd.f32 %v1954_v39, %v1774_v24  ;;  %v821_v41 = vpop.f32.mrb[5].mxu1 }
 0x231   : > { %v822_v42 = vadd.f32 %v1774_v24, %v821_v41  ;;  %v1955_v43 = vpop.f32.mrb[6].mxu1  ;;  %1980 = vmatprep.mubr.bf16.mxu0 %v884_v38 }
 0x232   : > { %v833_v44 = vadd.f32 %v1955_v43, %v1774_v24  ;;  %v824_v45 = vpop.f32.mrb[7].mxu1  ;;  %1981 = vmatmul.mubr.bf16.vlgmr.msra.gmra.mrb[16].mxu0 %v885_v37  ;;  %v874_v47 = vmax.f32 %v830_v40, 0.0 }
 0x233   : > { %v825_v46 = vadd.f32 %v1774_v24, %v824_v45  ;;  %v872_v49 = vmax.f32 %v822_v42, 0.0  ;;  %2029 = vmatpush3.bf16.msra.mxu0 %v2215_v19  ;;  %v2222_v19 = vld [vmem:[%s2878_s9 + $0x38] sm:$0xff]  }
 0x234   : > { %v875_v48 = vmax.f32 %v833_v44, 0.0  ;;  %2030 = vmatprep.subr.bf16.mxu0 %v2216_v20 }
 0x235   : > { %v873_v50 = vmax.f32 %v825_v46, 0.0 }
 0x236   : > { %v887_v51 = vpack.c.bf16 %v875_v48, %v874_v47 }
 0x237   : > { %v886_v52 = vpack.c.bf16 %v873_v50, %v872_v49  ;;  %v1958_v53 = vpop.f32.mrb[8].mxu1  ;;  %2031 = vmatpush3.bf16.msra.mxu0 %v2216_v20  ;;  %v2223_v20 = vld [vmem:[%s2880_s11] sm:$0xff]  }
 0x238   : > { %v846_v54 = vadd.f32 %v1958_v53, %v1774_v24  ;;  %v837_v55 = vpop.f32.mrb[9].mxu1  ;;  %2032 = vmatprep.subr.bf16.mxu0 %v2217_v21  ;;  %2092 = vmatprep.subr.bf16.mxu1 %v2223_v20 }
 0x239   : > { %v838_v56 = vadd.f32 %v1774_v24, %v837_v55  ;;  %v1959_v57 = vpop.f32.mrb[10].mxu1  ;;  %1984 = vmatprep.mubr.bf16.mxu0 %v886_v52 }
 0x23a   : > { %v849_v58 = vadd.f32 %v1959_v57, %v1774_v24  ;;  %v840_v59 = vpop.f32.mrb[11].mxu1  ;;  %1985 = vmatmul.mubr.bf16.gmra.mrb[20].mxu0 %v887_v51  ;;  %v878_v61 = vmax.f32 %v846_v54, 0.0 }
 0x23b   : > { %v841_v60 = vadd.f32 %v1774_v24, %v840_v59  ;;  %v876_v63 = vmax.f32 %v838_v56, 0.0  ;;  %2033 = vmatpush3.bf16.msra.mxu0 %v2217_v21  ;;  %v2224_v21 = vld [vmem:[%s2880_s11 + $0x8] sm:$0xff]  }
 0x23c   : > { %v879_v62 = vmax.f32 %v849_v58, 0.0  ;;  %2034 = vmatprep.subr.bf16.mxu0 %v2218_v22 }
 0x23d   : > { %v877_v0 = vmax.f32 %v841_v60, 0.0 }
 0x23e   : > { %v889_v1 = vpack.c.bf16 %v879_v62, %v878_v61 }
 0x23f   : > { %v888_v2 = vpack.c.bf16 %v877_v0, %v876_v63  ;;  %v1962_v3 = vpop.f32.mrb[12].mxu1  ;;  %2035 = vmatpush3.bf16.msra.mxu0 %v2218_v22  ;;  %v2225_v22 = vld [vmem:[%s2880_s11 + $0x10] sm:$0xff]  }
 0x240   : > { %v862_v4 = vadd.f32 %v1962_v3, %v1774_v24  ;;  %v853_v5 = vpop.f32.mrb[13].mxu1  ;;  %2036 = vmatprep.subr.bf16.mxu0 %v2219_v23 }
 0x241   : > { %v854_v6 = vadd.f32 %v1774_v24, %v853_v5  ;;  %v1963_v7 = vpop.f32.mrb[14].mxu1  ;;  %1988 = vmatprep.mubr.bf16.mxu0 %v888_v2 }
 0x242   : > { %v865_v8 = vadd.f32 %v1963_v7, %v1774_v24  ;;  %v856_v9 = vpop.f32.mrb[15].mxu1  ;;  %1989 = vmatmul.mubr.bf16.gmra.mrb[24].mxu0 %v889_v1  ;;  %v882_v11 = vmax.f32 %v862_v4, 0.0 }
 0x243   : > { %v857_v10 = vadd.f32 %v1774_v24, %v856_v9  ;;  %v880_v13 = vmax.f32 %v854_v6, 0.0  ;;  %v2220_v24 = vld [vmem:[%s2878_s9 + $0x28] sm:$0xff]   ;;  %2037 = vmatpush3.bf16.msra.mxu0 %v2219_v23  ;;  %v2742_v23 = vld [vmem:[%s2880_s11 + $0x18] sm:$0xff]  }
 0x244   : > { %v883_v12 = vmax.f32 %v865_v8, 0.0  ;;  %2038 = vmatprep.subr.bf16.mxu0 %v2220_v24 }
 0x245   : > { %v881_v14 = vmax.f32 %v857_v10, 0.0 }
 0x246   : > { %v891_v15 = vpack.c.bf16 %v883_v12, %v882_v11 }
 0x247   : > { %v890_v16 = vpack.c.bf16 %v881_v14, %v880_v13  ;;  %2039 = vmatpush3.bf16.msra.mxu0 %v2220_v24  ;;  %v2748_v24 = vld [vmem:[%s2880_s11 + $0x20] sm:$0xff]  }
 0x248   : > { %2040 = vmatprep.subr.bf16.mxu0 %v2221_v18 }
 0x249   : > { %1992 = vmatprep.mubr.bf16.mxu0 %v890_v16 }
 0x24a   : > { %1993 = vmatmul.mubr.bf16.gmra.mrb[28].mxu0 %v891_v15 }
 0x24b   : > { %2041 = vmatpush3.bf16.msra.mxu0 %v2221_v18 }
 0x24c   : > { %2042 = vmatprep.subr.bf16.mxu0 %v2222_v19 }
 0x24f   : > { %2043 = vmatpush3.bf16.msra.mxu0 %v2222_v19  ;;  %v2229_v19 = vld [vmem:[%s2880_s11 + $0x30] sm:$0xff]  }
 0x250   : > { %2060 = vmatprep.subr.bf16.mxu0 %v2223_v20 }
 0x305   : > { %v1982_v26 = vpop.f32.mrb[16].mxu0 }
 0x306   : > { %v1006_v27 = vadd.f32 %v1982_v26, %v1783_v25  ;;  %v997_v28 = vpop.f32.mrb[17].mxu0  ;;  %v2760_v26 = vld [vmem:[#allocation7] ss:$0 sm:$0xff] }
 0x307   : > { %v998_v29 = vadd.f32 %v1783_v25, %v997_v28  ;;  %v1983_v30 = vpop.f32.mrb[18].mxu0 }
 0x308   : > { %v1009_v31 = vadd.f32 %v1983_v30, %v1783_v25  ;;  %v1000_v32 = vpop.f32.mrb[19].mxu0  ;;  %v1062_v34 = vmax.f32 %v1006_v27, 0.0 }
 0x309   : > { %v1001_v33 = vadd.f32 %v1783_v25, %v1000_v32  ;;  %v1060_v36 = vmax.f32 %v998_v29, 0.0 }
 0x30a   : > { %v1063_v35 = vmax.f32 %v1009_v31, 0.0 }
 0x30b   : > { %v1061_v37 = vmax.f32 %v1001_v33, 0.0 }
 0x30c   : > { %v1077_v38 = vpack.c.bf16 %v1063_v35, %v1062_v34 }
 0x30d   : > { %v1076_v39 = vpack.c.bf16 %v1061_v37, %v1060_v36  ;;  %v1986_v40 = vpop.f32.mrb[20].mxu0 }
 0x30e   : > { %v1022_v41 = vadd.f32 %v1986_v40, %v1783_v25  ;;  %v1013_v42 = vpop.f32.mrb[21].mxu0 }
 0x30f   : > { %v1014_v43 = vadd.f32 %v1783_v25, %v1013_v42  ;;  %v1987_v44 = vpop.f32.mrb[22].mxu0  ;;  %2012 = vmatprep.mubr.bf16.mxu1 %v1076_v39 }
 0x310   : > { %v1025_v45 = vadd.f32 %v1987_v44, %v1783_v25  ;;  %v1016_v46 = vpop.f32.mrb[23].mxu0  ;;  %2013 = vmatmul.mubr.bf16.vlgmr.msra.gmra.mrb[16].mxu1 %v1077_v38  ;;  %v1066_v48 = vmax.f32 %v1022_v41, 0.0 }
 0x311   : > { %v1017_v47 = vadd.f32 %v1783_v25, %v1016_v46  ;;  %v1064_v50 = vmax.f32 %v1014_v43, 0.0  ;;  %2100 = vmatpush3.bf16.msra.mxu1 %v2223_v20 }
 0x312   : > { %v1067_v49 = vmax.f32 %v1025_v45, 0.0  ;;  %2093 = vmatprep.subr.bf16.mxu1 %v2224_v21 }
 0x313   : > { %v1065_v51 = vmax.f32 %v1017_v47, 0.0 }
 0x314   : > { %v1079_v52 = vpack.c.bf16 %v1067_v49, %v1066_v48 }
 0x315   : > { %v1078_v53 = vpack.c.bf16 %v1065_v51, %v1064_v50  ;;  %v1990_v54 = vpop.f32.mrb[24].mxu0  ;;  %2101 = vmatpush3.bf16.msra.mxu1 %v2224_v21 }
 0x316   : > { %v1038_v55 = vadd.f32 %v1990_v54, %v1783_v25  ;;  %v1029_v56 = vpop.f32.mrb[25].mxu0  ;;  %2094 = vmatprep.subr.bf16.mxu1 %v2225_v22 }
 0x317   : > { %v1030_v57 = vadd.f32 %v1783_v25, %v1029_v56  ;;  %v1991_v58 = vpop.f32.mrb[26].mxu0  ;;  %2016 = vmatprep.mubr.bf16.mxu1 %v1078_v53 }
 0x318   : > { %v1041_v59 = vadd.f32 %v1991_v58, %v1783_v25  ;;  %v1032_v60 = vpop.f32.mrb[27].mxu0  ;;  %2017 = vmatmul.mubr.bf16.gmra.mrb[20].mxu1 %v1079_v52  ;;  %v1070_v62 = vmax.f32 %v1038_v55, 0.0 }
 0x319   : > { %v1033_v61 = vadd.f32 %v1783_v25, %v1032_v60  ;;  %v1068_v0 = vmax.f32 %v1030_v57, 0.0  ;;  %2102 = vmatpush3.bf16.msra.mxu1 %v2225_v22 }
 0x31a   : > { %v1071_v63 = vmax.f32 %v1041_v59, 0.0  ;;  %2095 = vmatprep.subr.bf16.mxu1 %v2742_v23 }
 0x31b   : > { %v1069_v1 = vmax.f32 %v1033_v61, 0.0 }
 0x31c   : > { %v1081_v2 = vpack.c.bf16 %v1071_v63, %v1070_v62 }
 0x31d   : > { %v1080_v3 = vpack.c.bf16 %v1069_v1, %v1068_v0  ;;  %v1994_v4 = vpop.f32.mrb[28].mxu0  ;;  %2103 = vmatpush3.bf16.msra.mxu1 %v2742_v23 }
 0x31e   : > { %v1054_v5 = vadd.f32 %v1994_v4, %v1783_v25  ;;  %v1045_v6 = vpop.f32.mrb[29].mxu0  ;;  %2096 = vmatprep.subr.bf16.mxu1 %v2748_v24 }
 0x31f   : > { %v1046_v7 = vadd.f32 %v1783_v25, %v1045_v6  ;;  %v1995_v8 = vpop.f32.mrb[30].mxu0  ;;  %2020 = vmatprep.mubr.bf16.mxu1 %v1080_v3 }
 0x320   : > { %v1057_v9 = vadd.f32 %v1995_v8, %v1783_v25  ;;  %v1048_v10 = vpop.f32.mrb[31].mxu0  ;;  %2021 = vmatmul.mubr.bf16.gmra.mrb[24].mxu1 %v1081_v2  ;;  %v1074_v12 = vmax.f32 %v1054_v5, 0.0 }
 0x321   : > { %v1049_v11 = vadd.f32 %v1783_v25, %v1048_v10  ;;  %v1072_v14 = vmax.f32 %v1046_v7, 0.0  ;;  %v2755_v25 = vld [vmem:[%s2880_s11 + $0x28] sm:$0xff]   ;;  %2104 = vmatpush3.bf16.msra.mxu1 %v2748_v24 }
 0x322   : > { %v1075_v13 = vmax.f32 %v1057_v9, 0.0  ;;  %2097 = vmatprep.subr.bf16.mxu1 %v2755_v25 }
 0x323   : > { %v1073_v15 = vmax.f32 %v1049_v11, 0.0 }
 0x324   : > { %v1083_v16 = vpack.c.bf16 %v1075_v13, %v1074_v12 }
 0x325   : > { %v1082_v17 = vpack.c.bf16 %v1073_v15, %v1072_v14  ;;  %2105 = vmatpush3.bf16.msra.mxu1 %v2755_v25 }
 0x326   : > { %2098 = vmatprep.subr.bf16.mxu1 %v2229_v19 }
 0x327   : > { %2024 = vmatprep.mubr.bf16.mxu1 %v1082_v17 }
 0x328   : > { %2025 = vmatmul.mubr.bf16.gmra.mrb[28].mxu1 %v1083_v16 }
 0x329   : > { %2106 = vmatpush3.bf16.msra.mxu1 %v2229_v19 }
 0x3e3   : > { %v2014_v27 = vpop.f32.mrb[16].mxu1 }
 0x3e4   : > { %v1198_v28 = vadd.f32 %v2014_v27, %v2760_v26  ;;  %v1189_v29 = vpop.f32.mrb[17].mxu1 }
 0x3e5   : > { %v1190_v30 = vadd.f32 %v2760_v26, %v1189_v29  ;;  %v2015_v31 = vpop.f32.mrb[18].mxu1 }
 0x3e6   : > { %v1201_v32 = vadd.f32 %v2015_v31, %v2760_v26  ;;  %v1192_v33 = vpop.f32.mrb[19].mxu1  ;;  %v1254_v35 = vmax.f32 %v1198_v28, 0.0 }
 0x3e7   : > { %v1193_v34 = vadd.f32 %v2760_v26, %v1192_v33  ;;  %v1252_v37 = vmax.f32 %v1190_v30, 0.0 }
 0x3e8   : > { %v1255_v36 = vmax.f32 %v1201_v32, 0.0 }
 0x3e9   : > { %v1253_v38 = vmax.f32 %v1193_v34, 0.0 }
 0x3ea   : > { %v1269_v39 = vpack.c.bf16 %v1255_v36, %v1254_v35 }
 0x3eb   : > { %v1268_v40 = vpack.c.bf16 %v1253_v38, %v1252_v37  ;;  %v2018_v41 = vpop.f32.mrb[20].mxu1 }
 0x3ec   : > { %v1214_v42 = vadd.f32 %v2018_v41, %v2760_v26  ;;  %v1205_v43 = vpop.f32.mrb[21].mxu1 }
 0x3ed   : > { %v1206_v44 = vadd.f32 %v2760_v26, %v1205_v43  ;;  %v2019_v45 = vpop.f32.mrb[22].mxu1  ;;  %2044 = vmatprep.mubr.bf16.mxu0 %v1268_v40 }
 0x3ee   : > { %v1217_v46 = vadd.f32 %v2019_v45, %v2760_v26  ;;  %v1208_v47 = vpop.f32.mrb[23].mxu1  ;;  %2045 = vmatmul.mubr.bf16.vlgmr.msra.gmra.mrb[32].mxu0 %v1269_v39  ;;  %v1258_v49 = vmax.f32 %v1214_v42, 0.0 }
 0x3ef   : > { %v1209_v48 = vadd.f32 %v2760_v26, %v1208_v47  ;;  %2061 = vmatpush3.bf16.msra.mxu0 %v2223_v20  ;;  %v1256_v51 = vmax.f32 %v1206_v44, 0.0  ;;  %v2230_v20 = vld [vmem:[%s2880_s11 + $0x38] sm:$0xff]  }
 0x3f0   : > { %v1259_v50 = vmax.f32 %v1217_v46, 0.0  ;;  %2062 = vmatprep.subr.bf16.mxu0 %v2224_v21  ;;  %2099 = vmatprep.subr.bf16.mxu1 %v2230_v20 }
 0x3f1   : > { %v1257_v52 = vmax.f32 %v1209_v48, 0.0  ;;  %2107 = vmatpush3.bf16.msra.mxu1 %v2230_v20 }
 0x3f2   : > { %v1271_v53 = vpack.c.bf16 %v1259_v50, %v1258_v49 }
 0x3f3   : > { %v1270_v54 = vpack.c.bf16 %v1257_v52, %v1256_v51  ;;  %v2022_v55 = vpop.f32.mrb[24].mxu1  ;;  %2063 = vmatpush3.bf16.msra.mxu0 %v2224_v21 }
 0x3f4   : > { %v1230_v56 = vadd.f32 %v2022_v55, %v2760_v26  ;;  %v1221_v57 = vpop.f32.mrb[25].mxu1  ;;  %2064 = vmatprep.subr.bf16.mxu0 %v2225_v22 }
 0x3f5   : > { %v1222_v58 = vadd.f32 %v2760_v26, %v1221_v57  ;;  %v2023_v59 = vpop.f32.mrb[26].mxu1  ;;  %2048 = vmatprep.mubr.bf16.mxu0 %v1270_v54 }
 0x3f6   : > { %v1233_v60 = vadd.f32 %v2023_v59, %v2760_v26  ;;  %v1224_v61 = vpop.f32.mrb[27].mxu1  ;;  %2049 = vmatmul.mubr.bf16.gmra.mrb[36].mxu0 %v1271_v53  ;;  %v1262_v63 = vmax.f32 %v1230_v56, 0.0 }
 0x3f7   : > { %v1225_v62 = vadd.f32 %v2760_v26, %v1224_v61  ;;  %2065 = vmatpush3.bf16.msra.mxu0 %v2225_v22  ;;  %v1260_v1 = vmax.f32 %v1222_v58, 0.0  ;;  %v1801_v22 = vld [vmem:[%s2879_s10] ss:$0 sm:$0xff] }
 0x3f8   : > { %v1263_v0 = vmax.f32 %v1233_v60, 0.0  ;;  %2066 = vmatprep.subr.bf16.mxu0 %v2742_v23 }
 0x3f9   : > { %v1261_v2 = vmax.f32 %v1225_v62, 0.0  ;;  %v1810_v62 = vld [vmem:[%s2881_s12] ss:$0 sm:$0xff] }
 0x3fa   : > { %v1273_v3 = vpack.c.bf16 %v1263_v0, %v1262_v63 }
 0x3fb   : > { %v1272_v4 = vpack.c.bf16 %v1261_v2, %v1260_v1  ;;  %v2026_v5 = vpop.f32.mrb[28].mxu1  ;;  %2067 = vmatpush3.bf16.msra.mxu0 %v2742_v23 }
 0x3fc   : > { %v1246_v6 = vadd.f32 %v2026_v5, %v2760_v26  ;;  %v1237_v7 = vpop.f32.mrb[29].mxu1  ;;  %2068 = vmatprep.subr.bf16.mxu0 %v2748_v24 }
 0x3fd   : > { %v1238_v8 = vadd.f32 %v2760_v26, %v1237_v7  ;;  %v2027_v9 = vpop.f32.mrb[30].mxu1  ;;  %2052 = vmatprep.mubr.bf16.mxu0 %v1272_v4 }
 0x3fe   : > { %v1249_v10 = vadd.f32 %v2027_v9, %v2760_v26  ;;  %v1240_v11 = vpop.f32.mrb[31].mxu1  ;;  %2053 = vmatmul.mubr.bf16.gmra.mrb[40].mxu0 %v1273_v3  ;;  %v1266_v13 = vmax.f32 %v1246_v6, 0.0 }
 0x3ff   : > { %v1241_v12 = vadd.f32 %v2760_v26, %v1240_v11  ;;  %2069 = vmatpush3.bf16.msra.mxu0 %v2748_v24  ;;  %v1264_v15 = vmax.f32 %v1238_v8, 0.0 }
 0x400   : > { %v1267_v14 = vmax.f32 %v1249_v10, 0.0  ;;  %2070 = vmatprep.subr.bf16.mxu0 %v2755_v25 }
 0x401   : > { %v1265_v16 = vmax.f32 %v1241_v12, 0.0 }
 0x402   : > { %v1275_v17 = vpack.c.bf16 %v1267_v14, %v1266_v13 }
 0x403   : > { %v1274_v18 = vpack.c.bf16 %v1265_v16, %v1264_v15  ;;  %2071 = vmatpush3.bf16.msra.mxu0 %v2755_v25 }
 0x404   : > { %2072 = vmatprep.subr.bf16.mxu0 %v2229_v19 }
 0x405   : > { %2056 = vmatprep.mubr.bf16.mxu0 %v1274_v18 }
 0x406   : > { %2057 = vmatmul.mubr.bf16.gmra.mrb[44].mxu0 %v1275_v17 }
 0x407   : > { %2073 = vmatpush3.bf16.msra.mxu0 %v2229_v19 }
 0x408   : > { %2074 = vmatprep.subr.bf16.mxu0 %v2230_v20 }
 0x40b   : > { %2075 = vmatpush3.bf16.msra.mxu0 %v2230_v20 }
 0x4c1   : > { %v2046_v21 = vpop.f32.mrb[32].mxu0 }
 0x4c2   : > { %v1381_v23 = vpop.f32.mrb[33].mxu0  ;;  %v1390_v25 = vadd.f32 %v2046_v21, %v1801_v22 }
 0x4c3   : > { %v2047_v24 = vpop.f32.mrb[34].mxu0  ;;  %v1382_v28 = vadd.f32 %v1801_v22, %v1381_v23 }
 0x4c4   : > { %v1393_v26 = vadd.f32 %v2047_v24, %v1801_v22  ;;  %v1384_v27 = vpop.f32.mrb[35].mxu0 }
 0x4c5   : > { %v1385_v29 = vadd.f32 %v1801_v22, %v1384_v27 }
 0x4c6   : > { %v1445_v30 = vpack.c.bf16 %v1393_v26, %v1390_v25 }
 0x4c7   : > { %v1444_v31 = vpack.c.bf16 %v1385_v29, %v1382_v28 }
 0x4c9   : > { %v2050_v32 = vpop.f32.mrb[36].mxu0  ;;  %2076 = vmatprep.mubr.bf16.mxu0 %v1444_v31 }
 0x4ca   : > { %v1397_v33 = vpop.f32.mrb[37].mxu0  ;;  %2077 = vmatmul.mubr.bf16.vlgmr.msra.gmra.mrb[48].mxu0 %v1445_v30  ;;  %v1406_v35 = vadd.f32 %v2050_v32, %v1801_v22 }
 0x4cb   : > { %v2051_v34 = vpop.f32.mrb[38].mxu0  ;;  %v1398_v38 = vadd.f32 %v1801_v22, %v1397_v33 }
 0x4cc   : > { %v1409_v36 = vadd.f32 %v2051_v34, %v1801_v22  ;;  %v1400_v37 = vpop.f32.mrb[39].mxu0 }
 0x4cd   : > { %v1401_v39 = vadd.f32 %v1801_v22, %v1400_v37 }
 0x4ce   : > { %v1447_v40 = vpack.c.bf16 %v1409_v36, %v1406_v35 }
 0x4cf   : > { %v1446_v41 = vpack.c.bf16 %v1401_v39, %v1398_v38 }
 0x4d1   : > { %v2054_v42 = vpop.f32.mrb[40].mxu0  ;;  %2080 = vmatprep.mubr.bf16.mxu1 %v1446_v41 }
 0x4d2   : > { %v1413_v43 = vpop.f32.mrb[41].mxu0  ;;  %2081 = vmatmul.mubr.bf16.vlgmr.msra.gmra.mrb[32].mxu1 %v1447_v40  ;;  %v1422_v45 = vadd.f32 %v2054_v42, %v1801_v22 }
 0x4d3   : > { %v2055_v44 = vpop.f32.mrb[42].mxu0  ;;  %v1414_v48 = vadd.f32 %v1801_v22, %v1413_v43 }
 0x4d4   : > { %v1425_v46 = vadd.f32 %v2055_v44, %v1801_v22  ;;  %v1416_v47 = vpop.f32.mrb[43].mxu0 }
 0x4d5   : > { %v1417_v49 = vadd.f32 %v1801_v22, %v1416_v47 }
 0x4d6   : > { %v1449_v50 = vpack.c.bf16 %v1425_v46, %v1422_v45 }
 0x4d7   : > { %v1448_v51 = vpack.c.bf16 %v1417_v49, %v1414_v48 }
 0x4d9   : > { %v2058_v52 = vpop.f32.mrb[44].mxu0  ;;  %2084 = vmatprep.mubr.bf16.mxu1 %v1448_v51 }
 0x4da   : > { %v1429_v53 = vpop.f32.mrb[45].mxu0  ;;  %2085 = vmatmul.mubr.bf16.gmra.mrb[36].mxu1 %v1449_v50  ;;  %v1438_v55 = vadd.f32 %v2058_v52, %v1801_v22 }
 0x4db   : > { %v2059_v54 = vpop.f32.mrb[46].mxu0  ;;  %v1430_v58 = vadd.f32 %v1801_v22, %v1429_v53 }
 0x4dc   : > { %v1441_v56 = vadd.f32 %v2059_v54, %v1801_v22  ;;  %v1432_v57 = vpop.f32.mrb[47].mxu0 }
 0x4dd   : > { %v1433_v59 = vadd.f32 %v1801_v22, %v1432_v57 }
 0x4de   : > { %v1451_v60 = vpack.c.bf16 %v1441_v56, %v1438_v55 }
 0x4df   : > { %v1450_v61 = vpack.c.bf16 %v1433_v59, %v1430_v58 }
 0x4e1   : > { %2088 = vmatprep.mubr.bf16.mxu1 %v1450_v61 }
 0x4e2   : > { %2089 = vmatmul.mubr.bf16.gmra.mrb[40].mxu1 %v1451_v60 }
 0x59d   : > { %v2078_v63 = vpop.f32.mrb[48].mxu0 }
 0x59e   : > { %v1566_v0 = vadd.f32 %v2078_v63, %v1810_v62  ;;  %v1557_v1 = vpop.f32.mrb[49].mxu0 }
 0x59f   : > { %v1558_v2 = vadd.f32 %v1810_v62, %v1557_v1  ;;  %v2079_v3 = vpop.f32.mrb[50].mxu0 }
 0x5a0   : > { %1622 = vst [vmem:[%s2799_s28 + $0x10] sm:$0xff] %v1566_v0  ;;  %v1569_v4 = vadd.f32 %v2079_v3, %v1810_v62  ;;  %v1560_v5 = vpop.f32.mrb[51].mxu0 }
 0x5a1   : > { %1620 = vst [vmem:[%s2799_s28] sm:$0xff] %v1558_v2  ;;  %v1561_v6 = vadd.f32 %v1810_v62, %v1560_v5 }
 0x5a2   : > { %1623 = vst [vmem:[%s2799_s28 + $0x18] sm:$0xff] %v1569_v4 }
 0x5a3   : > { %1621 = vst [vmem:[%s2799_s28 + $0x8] sm:$0xff] %v1561_v6 }
 0x5a5   : > { %v2082_v7 = vpop.f32.mrb[32].mxu1 }
 0x5a6   : > { %v1582_v8 = vadd.f32 %v2082_v7, %v1810_v62  ;;  %v1573_v9 = vpop.f32.mrb[33].mxu1 }
 0x5a7   : > { %v1574_v10 = vadd.f32 %v1810_v62, %v1573_v9  ;;  %v2083_v11 = vpop.f32.mrb[34].mxu1 }
 0x5a8   : > { %1626 = vst [vmem:[%s2799_s28 + $0x30] sm:$0xff] %v1582_v8  ;;  %v1585_v12 = vadd.f32 %v2083_v11, %v1810_v62  ;;  %v1576_v13 = vpop.f32.mrb[35].mxu1 }
 0x5a9   : > { %1624 = vst [vmem:[%s2799_s28 + $0x20] sm:$0xff] %v1574_v10  ;;  %v1577_v14 = vadd.f32 %v1810_v62, %v1576_v13 }
 0x5aa   : > { %1627 = vst [vmem:[%s2799_s28 + $0x38] sm:$0xff] %v1585_v12 }
 0x5ab   : > { %1625 = vst [vmem:[%s2799_s28 + $0x28] sm:$0xff] %v1577_v14 }
 0x5ad   : > { %v2086_v15 = vpop.f32.mrb[36].mxu1 }
 0x5ae   : > { %v1598_v16 = vadd.f32 %v2086_v15, %v1810_v62  ;;  %v1589_v17 = vpop.f32.mrb[37].mxu1 }
 0x5af   : > { %v1590_v18 = vadd.f32 %v1810_v62, %v1589_v17  ;;  %v2087_v19 = vpop.f32.mrb[38].mxu1 }
 0x5b0   : > { %1630 = vst [vmem:[%s2799_s28 + $0x50] sm:$0xff] %v1598_v16  ;;  %v1601_v20 = vadd.f32 %v2087_v19, %v1810_v62  ;;  %v1592_v21 = vpop.f32.mrb[39].mxu1 }
 0x5b1   : > { %1628 = vst [vmem:[%s2799_s28 + $0x40] sm:$0xff] %v1590_v18  ;;  %v1593_v22 = vadd.f32 %v1810_v62, %v1592_v21 }
 0x5b2   : > { %1631 = vst [vmem:[%s2799_s28 + $0x58] sm:$0xff] %v1601_v20 }
 0x5b3   : > { %1629 = vst [vmem:[%s2799_s28 + $0x48] sm:$0xff] %v1593_v22 }
 0x5b5   : > { %v2090_v23 = vpop.f32.mrb[40].mxu1 }
 0x5b6   : > { %v1614_v24 = vadd.f32 %v2090_v23, %v1810_v62  ;;  %v1605_v25 = vpop.f32.mrb[41].mxu1 }
 0x5b7   : > { %v1606_v26 = vadd.f32 %v1810_v62, %v1605_v25  ;;  %v2091_v27 = vpop.f32.mrb[42].mxu1 }
 0x5b8   : > { %1634 = vst [vmem:[%s2799_s28 + $0x70] sm:$0xff] %v1614_v24  ;;  %v1617_v28 = vadd.f32 %v2091_v27, %v1810_v62  ;;  %v1608_v29 = vpop.f32.mrb[43].mxu1 }
 0x5b9   : > { %1632 = vst [vmem:[%s2799_s28 + $0x60] sm:$0xff] %v1606_v26  ;;  %v1609_v30 = vadd.f32 %v1810_v62, %v1608_v29 }
 0x5ba   : > { %1635 = vst [vmem:[%s2799_s28 + $0x78] sm:$0xff] %v1617_v28 }
 0x5bb   : > { %1633 = vst [vmem:[%s2799_s28 + $0x68] sm:$0xff] %v1609_v30 }
 0x5bc   : > { %2328 = shalt.err (!%p2325_p11)
}
 0x5bd   : > { %s2329_s14 = scalar_lea.hbm %s2819_s23, 2048  ;;  %s2333_s24 = scalar_lea.hbm %s2912_s19, 8192 }
 0x5be   : > { %p2330_p13 = scmp.ne.s32.totalorder %s2819_s23, %s2329_s14  ;;  %p2334_p6 = scmp.lt.u32.totalorder %s2819_s23, %s2912_s19 }
 0x5bf   : > { %p2335_p5 = scmp.lt.u32.totalorder %s2333_s24, %s2329_s14  ;;  %p2337_p12 = scmp.lt.u32.totalorder %s2329_s14, %s2819_s23 }
 0x5c0   : > { %p2331_p1 = pnand %p2330_p13, %p2913_p10 }
 0x5c1   : > { %p2336_p9 = por %p2335_p5, %p2334_p6 }
 0x5c2   : > { %p2332_p0 = pneg %p2331_p1 }
 0x5c3   : > { %p2338_p2 = por %p2337_p12, %p2336_p9 }
 0x5c5   : > { %p2339_p3 = pnand %p2338_p2, %p2332_p0 }
 0x5c7   : > { %2342 = shalt.err (!%p2339_p3)
}
 0x5c8   : > { %s2393_s6 = smov 128   ;;  %s2394_s16 = smov 8  }
 0x5c9   : > { %2120 = dma.vmem_to_hbm [thread:$0]  (%p2913_p10), %s2821_s30, 2048, %s2819_s23, %s2828_s29, %s2393_s6, %s2393_s6, %s2394_s16  }
 0x5ca PF: > { %s2914_s20 = sld [smem:[#allocation14_spill]]  ;;  %s2915_s25 = sld [smem:[#allocation12_spill]] }
 0x5cb   : > { %s2916_s21 = sld [smem:[#allocation17_spill]] }
 0x5d0   : > { %p2142_p4 = scmp.ge.s32.totalorder %s2914_s20, 2  ;;  %s1665_s15 = sand.u32 1, %s2915_s25  }
 0x5d1   : > { %p2917_p7 = scmp.ne.s32.totalorder %s2916_s21, 0  ;;  %s1666_s27 = scalar_lea.sflag [#allocation4], %s1665_s15 }
 0x5d3   : > { %p2133_p8 = pnand %p2142_p4, %p2917_p7 }
 0x5d5   : > { %2368 = dma.done.wait (!%p2133_p8), %s1666_s27, 2048  }
 0x5d6   : > { %2370 = vsyncadd (!%p2133_p8), %s1666_s27, 4294965248  ;;  %s2918_s28 = sld [smem:[#allocation15_spill]]  ;;  %s2919_s14 = sld [smem:[#allocation13_spill]] }
 0x5d7   : > { %s2920_s27 = sld [smem:[#allocation16_spill]]  ;;  %s2921_s25 = smov %s2377_s26 }
 0x5dc   : > { %p25_p11 = scmp.ge.s32.totalorder %s2918_s28, 6   ;;  %s2922_s26 = smov %s2919_s14 }
 0x5de   :  { %27 = sbr.rel (!%p25_p11) target bundleno = 8 (0x8), region = 120 }
 0x5e5   :  { %1671 = vsyncpa [#allocation3], 1 }
 0x5e6   :  { %1673 = vsyncpa [#allocation3 + $0x1], 1 }
 0x5e7   :  { %1674 = vsyncpa [#allocation6], 1 }
 0x5e8   :  { %1675 = vsyncpa [#allocation4], 1 }
 0x5e9   :  { %1677 = vsyncpa [#allocation4 + $0x1], 1 }

// kernel: tpu_custom_call.1
= control target key start
LH: loop header
LB: loop body
LE: loop exit
PB: predicated region body
PF: predicated region fallthrough
CT: control target
= control target key end

     0   :  { %s2869_s0 = inlined_call_operand.vmem [shape: bf16[512,16], index: 0, kind: input, shape index: {}]   ;;  %s2870_s1 = inlined_call_operand.hbm [shape: bf16[16,128], index: 1, kind: input, shape index: {}]   ;;  %s2871_s2 = inlined_call_operand.vmem [shape: f32[1,128], index: 2, kind: input, shape index: {}]   ;;  %s2872_s3 = inlined_call_operand.vmem [shape: bf16[128,128], index: 3, kind: input, shape index: {}]   ;;  %s2873_s4 = inlined_call_operand.vmem [shape: f32[1,128], index: 4, kind: input, shape index: {}]   ;;  %s2874_s5 = inlined_call_operand.vmem [shape: bf16[128,128], index: 5, kind: input, shape index: {}]   ;;  %s2875_s6 = inlined_call_operand.hbm [shape: f32[1,128], index: 6, kind: input, shape index: {}]   ;;  %s2876_s7 = inlined_call_operand.vmem [shape: bf16[128,128], index: 7, kind: input, shape index: {}]   ;;  %s2877_s8 = inlined_call_operand.hbm [shape: f32[1,128], index: 8, kind: input, shape index: {}]   ;;  %s2878_s9 = inlined_call_operand.vmem [shape: bf16[128,128], index: 9, kind: input, shape index: {}]   ;;  %s2879_s10 = inlined_call_operand.vmem [shape: f32[1,128], index: 10, kind: input, shape index: {}]   ;;  %s2880_s11 = inlined_call_operand.vmem [shape: bf16[128,128], index: 11, kind: input, shape index: {}]   ;;  %s2881_s12 = inlined_call_operand.vmem [shape: f32[1,128], index: 12, kind: input, shape index: {}]   ;;  %s2882_s13 = inlined_call_operand.hbm [shape: f32[512,128], index: 13, kind: output, shape index: {}]  }
   0x1   :  { %2893 = sst [smem:[#allocation18_spill]] %s2875_s6 }
   0x2   :  { %2894 = sst [smem:[#allocation19_spill]] %s2882_s13 }
   0x3   :  { %18 = vsyncpa [#allocation3], 0 }
   0x4   :  { %19 = vsyncpa [#allocation6], 0 }
   0x5   :  { %20 = vsyncpa [#allocation4], 0 }
   0x6   :  { %22 = vsyncpa [#allocation4 + $0x1], 0  ;;  %s2465_s25 = smov 0   ;;  %s2467_s26 = smov 0  }
   0x7   :  { %s2469_s27 = smov 0   ;;  %s2471_s28 = smov 0  }
   0x8 LB: > { %2895 = sst [smem:[#allocation12_spill]] %s2373_s25  ;;  %s2486_s29 = sadd.s32 4294967295, %s2385_s28   ;;  %s2385_s28 = sphi %s2471_s28, %s2918_s28   ;;  %s2381_s27 = sphi %s2469_s27, %s2920_s27   ;;  %s2377_s26 = sphi %s2467_s26, %s2922_s26   ;;  %s2373_s25 = sphi %s2465_s25, %s2921_s25  }
   0x9   : > { %2896 = sst [smem:[#allocation13_spill]] %s2381_s27  ;;  %s1743_s30 = sadd.s32 4294967294, %s2385_s28  }
   0xa   : > { %2897 = sst [smem:[#allocation14_spill]] %s2385_s28  ;;  %s2490_s14 = sadd.s32 1, %s2385_s28  }
   0xb   : > { %2898 = sst [smem:[#allocation15_spill]] %s2490_s14  ;;  %s313_s15 = sadd.s32 1, %s2381_s27 }
   0xc   : > { %s310_s16 = ssub.s32 %s2385_s28, %s2490_s14  ;;  %p323_p0 = scmp.ne.s32.totalorder %s2381_s27, %s2377_s26 }
   0xd   : > { %p311_p1 = scmp.eq.s32.totalorder %s310_s16, 0  ;;  %p324_p2 = scmp.eq.s32.totalorder %s2486_s29, 3 }
   0xe   : > { %p329_p3 = scmp.ne.s32.totalorder %s2377_s26, %s2373_s25  ;;  %p330_p4 = scmp.eq.s32.totalorder %s1743_s30, 3 }
   0xf   : > { %s2501_s17 = scalar_select %p311_p1, %s2381_s27, %s313_s15  }
  0x10   : > { %p2503_p5 = por %p324_p2, %p323_p0  ;;  %p2507_p6 = por %p330_p4, %p329_p3 }
  0x11   : > { %2899 = sst [smem:[#allocation16_spill]] %s2501_s17  ;;  %p1744_p7 = scmp.ge.s32.totalorder %s2385_s28, 1 }
  0x12   : > { %s2900_s18 = scalar_select %p2503_p5, 1, 0 }
  0x13   : > { %s2901_s19 = scalar_select %p2507_p6, 1, 0 }
  0x14   : > { %p337_p8 = scmp.lt.s32.totalorder %s2385_s28, 5  ;;  %p2888_p9 = scmp.eq.s32.totalorder %s2486_s29, 0 }
  0x15   : > { %2902 = sst [smem:[#allocation17_spill]] %s2901_s19  ;;  %s2387_s21 = smov [#allocation5]  }
  0x16   : > { %p2514_p10 = pnand %p1744_p7, %p337_p8  ;;  %s375_s22 = sshll.u32 %s2387_s21, 4  ;;  %s376_s22 = int_to_ptr.vmem [resolvable:$true] %s375_s22 }
  0x17   : > { %s2388_s23 = smov [#allocation2]   ;;  %s2389_s15 = smov [#allocation7]  }
  0x18   : > { %s2903_s20 = scalar_select %p2514_p10, 1, 0 }
  0x19   : > { %p2122_p11 = pneg %p2514_p10  ;;  %s349_s24 = sshll.u32 %s2388_s23, 4  ;;  %s2526_s24 = int_to_ptr.vmem [resolvable:$true] %s349_s24 }
  0x1a   : > { %s2528_s16 = sshll.u32 %s2389_s15, 4  ;;  %s2905_s6 = sld [smem:[#allocation18_spill]]  ;;  %s390_s16 = int_to_ptr.vmem [resolvable:$true] %s2528_s16 }
  0x1b   : > { %p2522_p12 = pnand %p2888_p9, %p2122_p11 }
  0x1d   : > { %p2538_p0 = pneg %p2522_p12 }
  0x20   : > { %s2231_s21 = scalar_lea.hbm %s2905_s6, 16 }
  0x21   : > { %p2232_p13 = scmp.ne.s32.totalorder %s2905_s6, %s2231_s21  ;;  %p2238_p3 = scmp.lt.u32.totalorder %s2231_s21, %s2905_s6 }
  0x23   : > { %p2234_p1 = pnand %p2538_p0, %p2232_p13 }
  0x25   : > { %p2235_p2 = pneg %p2234_p1 }
  0x27   : > { %p2240_p4 = pnand %p2238_p3, %p2235_p2 }
  0x29   : > { %2243 = shalt.err (!%p2240_p4)
}
  0x2a   : > { %s2244_s27 = scalar_lea.vmem %s376_s22, 16  ;;  %s2251_s14 = scalar_lea.vmem %s376_s22, 32 }
  0x2b   : > { %p2245_p7 = scmp.ne.s32.totalorder %s376_s22, %s2244_s27  ;;  %p2252_p9 = scmp.lt.s32.totalorder %s376_s22, %s376_s22 }
  0x2c   : > { %p2253_p6 = scmp.lt.s32.totalorder %s2251_s14, %s2244_s27 }
  0x2d   : > { %p2247_p8 = pnand %p2245_p7, %p2538_p0 }
  0x2e   : > { %p2254_p5 = por %p2253_p6, %p2252_p9 }
  0x2f   : > { %p2248_p11 = pneg %p2247_p8 }
  0x31   : > { %p2255_p10 = pnand %p2254_p5, %p2248_p11 }
  0x33   : > { %2258 = shalt.err (!%p2255_p10)
}
  0x34   : > { %2128 = dma.hbm_to_vmem [thread:$0]  (!%p2522_p12), %s2905_s6, 16, %s376_s22, [#allocation6]  }
  0x35   : > { %s2259_s15 = scalar_lea.hbm %s2870_s1, 128 }
  0x36   : > { %p2260_p13 = scmp.ne.s32.totalorder %s2870_s1, %s2259_s15  ;;  %p2266_p5 = scmp.lt.u32.totalorder %s2259_s15, %s2870_s1 }
  0x38   : > { %p2262_p1 = pnand %p2260_p13, %p2538_p0 }
  0x3a   : > { %p2263_p6 = pneg %p2262_p1 }
  0x3c   : > { %p2268_p9 = pnand %p2266_p5, %p2263_p6 }
  0x3e   : > { %2271 = shalt.err (!%p2268_p9)
}
  0x3f   : > { %s2272_s22 = scalar_lea.vmem %s2526_s24, 128  ;;  %p2280_p4 = scmp.lt.s32.totalorder %s2526_s24, %s2526_s24 }
  0x40   : > { %p2273_p10 = scmp.ne.s32.totalorder %s2526_s24, %s2272_s22  ;;  %p2281_p7 = scmp.lt.s32.totalorder %s2272_s22, %s2272_s22 }
  0x42   : > { %p2275_p2 = pnand %p2273_p10, %p2538_p0  ;;  %p2282_p8 = por %p2281_p7, %p2280_p4 }
  0x44   : > { %p2276_p3 = pneg %p2275_p2 }
  0x46   : > { %p2283_p11 = pnand %p2282_p8, %p2276_p3 }
  0x48   : > { %2286 = shalt.err (!%p2283_p11)
}
  0x49   : > { %s2390_s13 = smov 64   ;;  %s2391_s28 = smov 4  }
  0x4a   : > { %2125 = dma.hbm_to_vmem [thread:$0]  (!%p2522_p12), %s2870_s1, 128, %s2526_s24, [#allocation3], %s2390_s13, %s2390_s13, %s2391_s28  }
  0x4b   : > { %s2287_s15 = scalar_lea.hbm %s2877_s8, 16 }
  0x4c   : > { %p2288_p13 = scmp.ne.s32.totalorder %s2877_s8, %s2287_s15  ;;  %p2294_p5 = scmp.lt.u32.totalorder %s2287_s15, %s2877_s8 }
  0x4e   : > { %p2290_p1 = pnand %p2288_p13, %p2538_p0 }
  0x50   : > { %p2291_p6 = pneg %p2290_p1 }
  0x52   : > { %p2296_p9 = pnand %p2294_p5, %p2291_p6 }
  0x54   : > { %2299 = shalt.err (!%p2296_p9)
}
  0x55   : > { %s2300_s17 = scalar_lea.vmem %s390_s16, 16  ;;  %s2307_s24 = scalar_lea.vmem %s390_s16, 32 }
  0x56   : > { %p2301_p10 = scmp.ne.s32.totalorder %s390_s16, %s2300_s17  ;;  %p2308_p4 = scmp.lt.s32.totalorder %s390_s16, %s390_s16 }
  0x57   : > { %p2309_p7 = scmp.lt.s32.totalorder %s2307_s24, %s2300_s17 }
  0x58   : > { %p2303_p2 = pnand %p2301_p10, %p2538_p0 }
  0x59   : > { %p2310_p8 = por %p2309_p7, %p2308_p4 }
  0x5a   : > { %p2304_p3 = pneg %p2303_p2 }
  0x5c   : > { %p2311_p11 = pnand %p2310_p8, %p2304_p3 }
  0x5e   : > { %2314 = shalt.err (!%p2311_p11)
}
  0x5f   : > { %2131 = dma.hbm_to_vmem [thread:$0]  (!%p2522_p12), %s2877_s8, 16, %s390_s16, [#allocation6]  }
  0x60   : > { %p2907_p13 = scmp.ne.s32.totalorder %s2903_s20, 0 }
  0x61   : > { %p2908_p1 = scmp.eq.s32.totalorder (!%p2907_p13), %s2486_s29, 0 }
  0x62   : > { %423 = sbr.rel (%p2907_p13) target bundleno = 1482 (0x5ca), region = 72 }
  0x69   : > { %2360 = dma.done.wait (%p2908_p1), [#allocation3], 128   ;;  %p2909_p0 = pmov %p2908_p1 }
  0x6b   : > { %2362 = vsyncadd (%p2909_p0), [#allocation3], 4294967168  ;;  %p2910_p6 = pmov %p2909_p0 }
  0x6c   : > { %p2911_p5 = pmov %p2909_p0 }
  0x6d   : > { %2364 = dma.done.wait (%p2910_p6), [#allocation6], 32  }
  0x6e   : > { %2366 = vsyncadd (%p2911_p5), [#allocation6], 4294967264  ;;  %s1754_s6 = sshll.u32 %s2486_s29, 4  ;;  %v2182_v0 = vld [vmem:[#allocation2] sm:$0xff]   ;;  %vm554_vm0 = vcmask 130048   ;;  %v2192_v6 = vld [vmem:[%s2872_s3 + $0x8] sm:$0xff]  }
  0x6f   : > { %p476_p9 = scmp.lt.s32.totalorder %s1754_s6, 63  ;;  %1914 = vmatprep.subr.bf16.mxu0 %v2182_v0  ;;  %v2191_v5 = vld [vmem:[%s2872_s3] sm:$0xff]   ;;  %v2193_v8 = vld [vmem:[%s2872_s3 + $0x10] sm:$0xff]   ;;  %v2194_v9 = vld [vmem:[%s2872_s3 + $0x18] sm:$0xff]   ;;  %s472_s22 = sand.u32 1, %s2377_s26  }
  0x70   : > { %1915 = vmatpush3.bf16.msra.mxu0 %v2182_v0  ;;  %1932 = vmatprep.subr.bf16.mxu1 %v2191_v5  ;;  %v2195_v12 = vld [vmem:[%s2872_s3 + $0x20] sm:$0xff]   ;;  %v2196_v13 = vld [vmem:[%s2872_s3 + $0x28] sm:$0xff]   ;;  %v2197_v15 = vld [vmem:[%s2872_s3 + $0x30] sm:$0xff]   ;;  %s1753_s17 = sshll.u32 %s472_s22, 7  ;;  %s2912_s19 = sld [smem:[#allocation19_spill]] }
  0x71   : > { %s2924_s6 = smov (!%p476_p9, %s1754_s6), 63  ;;  %1933 = vmatpush3.bf16.msra.mxu1 %v2191_v5  ;;  %v2198_v16 = vld [vmem:[%s2872_s3 + $0x38] sm:$0xff]   ;;  %v2199_v17 = vld [vmem:[%s2874_s5] sm:$0xff]   ;;  %v2200_v18 = vld [vmem:[%s2874_s5 + $0x8] sm:$0xff]   ;;  %s2799_s28 = scalar_lea.vmem [#allocation8], %s1753_s17 }
  0x72   : > { %s1755_s30 = sshll.u32 %s2924_s6, 2  ;;  %1934 = vmatprep.subr.bf16.mxu1 %v2192_v6  ;;  %1964 = vmatprep.subr.bf16.mxu0 %v2199_v17  ;;  %v2201_v19 = vld [vmem:[%s2874_s5 + $0x10] sm:$0xff]   ;;  %v2202_v20 = vld [vmem:[%s2874_s5 + $0x18] sm:$0xff]   ;;  %v2203_v21 = vld [vmem:[%s2874_s5 + $0x20] sm:$0xff]   ;;  %s1824_s6 = sshll.u32 %s2486_s29, 11 }
  0x73   : > { %s2610_s23 = scalar_lea.vmem %s2869_s0, %s1755_s30  ;;  %v2204_v22 = vld [vmem:[%s2874_s5 + $0x28] sm:$0xff]   ;;  %v1756_v23 = vld [vmem:[%s2871_s2] ss:$0 sm:$0xff]  ;;  %s1650_s30 = sshll.u32 %s2799_s28, 4  ;;  %s2821_s30 = int_to_ptr.vmem [resolvable:$true] %s1650_s30 }
  0x74   : > { %v2183_v1 = vld [vmem:[%s2610_s23] sm:$0xff]   ;;  %v2184_v2 = vld [vmem:[%s2610_s23 + $0x8] sm:$0xff]   ;;  %v2185_v3 = vld [vmem:[%s2610_s23 + $0x10] sm:$0xff]   ;;  %s2828_s29 = scalar_lea.sflag [#allocation4], %s472_s22  ;;  %s2315_s25 = scalar_lea.vmem %s2821_s30, 2048 }
  0x75   : > { %1916 = vmatprep.mubr.msk.bf16.mxu0 %vm554_vm0, %v2183_v1  ;;  %v2186_v4 = vld [vmem:[%s2610_s23 + $0x18] sm:$0xff]   ;;  %v2187_v7 = vld [vmem:[%s2610_s23 + $0x20] sm:$0xff]   ;;  %v2188_v10 = vld [vmem:[%s2610_s23 + $0x28] sm:$0xff]   ;;  %1935 = vmatpush3.bf16.msra.mxu1 %v2192_v6  ;;  %p2316_p12 = scmp.ne.s32.totalorder %s2821_s30, %s2315_s25  ;;  %p2913_p10 = scmp.ne.s32.totalorder %s2900_s18, 0 }
  0x76   : > { %1917 = vmatmul.mubr.msk.bf16.vlgmr.msra.gmra.mrb[0].mxu0 %vm554_vm0, %v2184_v2  ;;  %v2189_v11 = vld [vmem:[%s2610_s23 + $0x30] sm:$0xff]   ;;  %1936 = vmatprep.subr.bf16.mxu1 %v2193_v8  ;;  %v2190_v14 = vld [vmem:[%s2610_s23 + $0x38] sm:$0xff]   ;;  %s2819_s23 = scalar_lea.hbm %s2912_s19, %s1824_s6  ;;  %s2392_s21 = smov [#allocation8]  }
  0x77   : > { %1920 = vmatprep.mubr.msk.bf16.mxu0 %vm554_vm0, %v2185_v3  ;;  %1965 = vmatpush3.bf16.msra.mxu0 %v2199_v17  ;;  %v2206_v17 = vld [vmem:[%s2874_s5 + $0x38] sm:$0xff]   ;;  %p2317_p2 = pnand %p2316_p12, %p2913_p10  ;;  %s2319_s15 = sshll.u32 %s2392_s21, 4  ;;  %s2320_s15 = int_to_ptr.vmem [resolvable:$false] %s2319_s15 }
  0x78   : > { %1966 = vmatprep.subr.bf16.mxu0 %v2200_v18  ;;  %s2321_s27 = scalar_lea.vmem %s2320_s15, 4096  ;;  %p2322_p4 = scmp.lt.s32.totalorder %s2821_s30, %s2320_s15 }
  0x79   : > { %1937 = vmatpush3.bf16.msra.mxu1 %v2193_v8  ;;  %p2318_p3 = pneg %p2317_p2  ;;  %p2323_p7 = scmp.lt.s32.totalorder %s2321_s27, %s2315_s25 }
  0x7a   : > { %1938 = vmatprep.subr.bf16.mxu1 %v2194_v9 }
  0x7b   : > { %1967 = vmatpush3.bf16.msra.mxu0 %v2200_v18  ;;  %v2207_v18 = vld [vmem:[%s2876_s7] sm:$0xff]   ;;  %p2324_p8 = por %p2323_p7, %p2322_p4 }
  0x7c   : > { %1968 = vmatprep.subr.bf16.mxu0 %v2201_v19 }
  0x7d   : > { %1939 = vmatpush3.bf16.msra.mxu1 %v2194_v9  ;;  %p2325_p11 = pnand %p2324_p8, %p2318_p3 }
  0x7e   : > { %1921 = vmatmul.mubr.msk.bf16.gmra.mrb[4].mxu0 %vm554_vm0, %v2186_v4  ;;  %1940 = vmatprep.subr.bf16.mxu1 %v2195_v12 }
  0x7f   : > { %1924 = vmatprep.mubr.msk.bf16.mxu0 %vm554_vm0, %v2187_v7  ;;  %1969 = vmatpush3.bf16.msra.mxu0 %v2201_v19  ;;  %v2208_v19 = vld [vmem:[%s2876_s7 + $0x8] sm:$0xff]  }
  0x80   : > { %1970 = vmatprep.subr.bf16.mxu0 %v2202_v20 }
  0x81   : > { %1941 = vmatpush3.bf16.msra.mxu1 %v2195_v12 }
  0x82   : > { %1942 = vmatprep.subr.bf16.mxu1 %v2196_v13 }
  0x83   : > { %1971 = vmatpush3.bf16.msra.mxu0 %v2202_v20  ;;  %v2209_v20 = vld [vmem:[%s2876_s7 + $0x10] sm:$0xff]  }
  0x84   : > { %1972 = vmatprep.subr.bf16.mxu0 %v2203_v21 }
  0x85   : > { %1943 = vmatpush3.bf16.msra.mxu1 %v2196_v13 }
  0x86   : > { %1925 = vmatmul.mubr.msk.bf16.gmra.mrb[8].mxu0 %vm554_vm0, %v2188_v10  ;;  %1944 = vmatprep.subr.bf16.mxu1 %v2197_v15 }
  0x87   : > { %1928 = vmatprep.mubr.msk.bf16.mxu0 %vm554_vm0, %v2189_v11  ;;  %1973 = vmatpush3.bf16.msra.mxu0 %v2203_v21  ;;  %v2210_v21 = vld [vmem:[%s2876_s7 + $0x18] sm:$0xff]  }
  0x88   : > { %1974 = vmatprep.subr.bf16.mxu0 %v2204_v22 }
  0x89   : > { %1945 = vmatpush3.bf16.msra.mxu1 %v2197_v15 }
  0x8a   : > { %1946 = vmatprep.subr.bf16.mxu1 %v2198_v16 }
  0x8b   : > { %1975 = vmatpush3.bf16.msra.mxu0 %v2204_v22  ;;  %v2211_v22 = vld [vmem:[%s2876_s7 + $0x20] sm:$0xff]  }
  0x8d   : > { %1947 = vmatpush3.bf16.msra.mxu1 %v2198_v16  ;;  %v2205_v16 = vld [vmem:[%s2874_s5 + $0x30] sm:$0xff]  }
  0x8e   : > { %1929 = vmatmul.mubr.msk.bf16.gmra.mrb[12].mxu0 %vm554_vm0, %v2190_v14  ;;  %1976 = vmatprep.subr.bf16.mxu0 %v2205_v16 }
  0x8f   : > { %1977 = vmatpush3.bf16.msra.mxu0 %v2205_v16  ;;  %1996 = vmatprep.subr.bf16.mxu1 %v2207_v18 }
  0x90   : > { %1978 = vmatprep.subr.bf16.mxu0 %v2206_v17 }
  0x93   : > { %1979 = vmatpush3.bf16.msra.mxu0 %v2206_v17  ;;  %v2213_v17 = vld [vmem:[%s2876_s7 + $0x30] sm:$0xff]  }
 0x149   : > { %v1918_v24 = vpop.f32.mrb[0].mxu0 }
 0x14a   : > { %v622_v25 = vadd.f32 %v1918_v24, %v1756_v23  ;;  %v613_v26 = vpop.f32.mrb[1].mxu0  ;;  %v1774_v24 = vld [vmem:[%s2873_s4] ss:$0 sm:$0xff] }
 0x14b   : > { %v614_v27 = vadd.f32 %v1756_v23, %v613_v26  ;;  %v1919_v28 = vpop.f32.mrb[2].mxu0 }
 0x14c   : > { %v625_v29 = vadd.f32 %v1919_v28, %v1756_v23  ;;  %v616_v30 = vpop.f32.mrb[3].mxu0  ;;  %v678_v32 = vmax.f32 %v622_v25, 0.0 }
 0x14d   : > { %v617_v31 = vadd.f32 %v1756_v23, %v616_v30  ;;  %v676_v34 = vmax.f32 %v614_v27, 0.0 }
 0x14e   : > { %v679_v33 = vmax.f32 %v625_v29, 0.0 }
 0x14f   : > { %v677_v35 = vmax.f32 %v617_v31, 0.0 }
 0x150   : > { %v693_v36 = vpack.c.bf16 %v679_v33, %v678_v32 }
 0x151   : > { %v1922_v37 = vpop.f32.mrb[4].mxu0  ;;  %v692_v38 = vpack.c.bf16 %v677_v35, %v676_v34 }
 0x152   : > { %v638_v39 = vadd.f32 %v1922_v37, %v1756_v23  ;;  %v629_v40 = vpop.f32.mrb[5].mxu0 }
 0x153   : > { %v630_v41 = vadd.f32 %v1756_v23, %v629_v40  ;;  %v1923_v42 = vpop.f32.mrb[6].mxu0  ;;  %1948 = vmatprep.mubr.bf16.mxu1 %v692_v38 }
 0x154   : > { %v641_v43 = vadd.f32 %v1923_v42, %v1756_v23  ;;  %v632_v44 = vpop.f32.mrb[7].mxu0  ;;  %1949 = vmatmul.mubr.bf16.vlgmr.msra.gmra.mrb[0].mxu1 %v693_v36  ;;  %v682_v46 = vmax.f32 %v638_v39, 0.0 }
 0x155   : > { %v633_v45 = vadd.f32 %v1756_v23, %v632_v44  ;;  %v680_v48 = vmax.f32 %v630_v41, 0.0  ;;  %1997 = vmatpush3.bf16.msra.mxu1 %v2207_v18  ;;  %v2214_v18 = vld [vmem:[%s2876_s7 + $0x38] sm:$0xff]  }
 0x156   : > { %v683_v47 = vmax.f32 %v641_v43, 0.0  ;;  %1998 = vmatprep.subr.bf16.mxu1 %v2208_v19 }
 0x157   : > { %v681_v49 = vmax.f32 %v633_v45, 0.0 }
 0x158   : > { %v695_v50 = vpack.c.bf16 %v683_v47, %v682_v46 }
 0x159   : > { %v694_v51 = vpack.c.bf16 %v681_v49, %v680_v48  ;;  %v1926_v52 = vpop.f32.mrb[8].mxu0  ;;  %1999 = vmatpush3.bf16.msra.mxu1 %v2208_v19  ;;  %v2215_v19 = vld [vmem:[%s2878_s9] sm:$0xff]  }
 0x15a   : > { %v654_v53 = vadd.f32 %v1926_v52, %v1756_v23  ;;  %v645_v54 = vpop.f32.mrb[9].mxu0  ;;  %2000 = vmatprep.subr.bf16.mxu1 %v2209_v20  ;;  %2028 = vmatprep.subr.bf16.mxu0 %v2215_v19 }
 0x15b   : > { %v646_v55 = vadd.f32 %v1756_v23, %v645_v54  ;;  %v1927_v56 = vpop.f32.mrb[10].mxu0  ;;  %1952 = vmatprep.mubr.bf16.mxu1 %v694_v51 }
 0x15c   : > { %v657_v57 = vadd.f32 %v1927_v56, %v1756_v23  ;;  %v648_v58 = vpop.f32.mrb[11].mxu0  ;;  %1953 = vmatmul.mubr.bf16.gmra.mrb[4].mxu1 %v695_v50  ;;  %v686_v60 = vmax.f32 %v654_v53, 0.0 }
 0x15d   : > { %v649_v59 = vadd.f32 %v1756_v23, %v648_v58  ;;  %v684_v62 = vmax.f32 %v646_v55, 0.0  ;;  %2001 = vmatpush3.bf16.msra.mxu1 %v2209_v20  ;;  %v2216_v20 = vld [vmem:[%s2878_s9 + $0x8] sm:$0xff]  }
 0x15e   : > { %v687_v61 = vmax.f32 %v657_v57, 0.0  ;;  %2002 = vmatprep.subr.bf16.mxu1 %v2210_v21 }
 0x15f   : > { %v685_v63 = vmax.f32 %v649_v59, 0.0 }
 0x160   : > { %v697_v0 = vpack.c.bf16 %v687_v61, %v686_v60 }
 0x161   : > { %v696_v1 = vpack.c.bf16 %v685_v63, %v684_v62  ;;  %v1930_v2 = vpop.f32.mrb[12].mxu0  ;;  %2003 = vmatpush3.bf16.msra.mxu1 %v2210_v21  ;;  %v2217_v21 = vld [vmem:[%s2878_s9 + $0x10] sm:$0xff]  }
 0x162   : > { %v670_v3 = vadd.f32 %v1930_v2, %v1756_v23  ;;  %v661_v4 = vpop.f32.mrb[13].mxu0  ;;  %2004 = vmatprep.subr.bf16.mxu1 %v2211_v22 }
 0x163   : > { %v662_v5 = vadd.f32 %v1756_v23, %v661_v4  ;;  %v1931_v6 = vpop.f32.mrb[14].mxu0  ;;  %1956 = vmatprep.mubr.bf16.mxu1 %v696_v1 }
 0x164   : > { %v673_v7 = vadd.f32 %v1931_v6, %v1756_v23  ;;  %v664_v8 = vpop.f32.mrb[15].mxu0  ;;  %1957 = vmatmul.mubr.bf16.gmra.mrb[8].mxu1 %v697_v0  ;;  %v690_v10 = vmax.f32 %v670_v3, 0.0 }
 0x165   : > { %v665_v9 = vadd.f32 %v1756_v23, %v664_v8  ;;  %v688_v12 = vmax.f32 %v662_v5, 0.0  ;;  %v2212_v23 = vld [vmem:[%s2876_s7 + $0x28] sm:$0xff]   ;;  %2005 = vmatpush3.bf16.msra.mxu1 %v2211_v22  ;;  %v2218_v22 = vld [vmem:[%s2878_s9 + $0x18] sm:$0xff]  }
 0x166   : > { %v691_v11 = vmax.f32 %v673_v7, 0.0  ;;  %2006 = vmatprep.subr.bf16.mxu1 %v2212_v23 }
 0x167   : > { %v689_v13 = vmax.f32 %v665_v9, 0.0 }
 0x168   : > { %v699_v14 = vpack.c.bf16 %v691_v11, %v690_v10 }
 0x169   : > { %v698_v15 = vpack.c.bf16 %v689_v13, %v688_v12  ;;  %2007 = vmatpush3.bf16.msra.mxu1 %v2212_v23  ;;  %v2219_v23 = vld [vmem:[%s2878_s9 + $0x20] sm:$0xff]  }
 0x16a   : > { %2008 = vmatprep.subr.bf16.mxu1 %v2213_v17 }
 0x16b   : > { %1960 = vmatprep.mubr.bf16.mxu1 %v698_v15 }
 0x16c   : > { %1961 = vmatmul.mubr.bf16.gmra.mrb[12].mxu1 %v699_v14 }
 0x16d   : > { %2009 = vmatpush3.bf16.msra.mxu1 %v2213_v17 }
 0x16e   : > { %2010 = vmatprep.subr.bf16.mxu1 %v2214_v18 }
 0x171   : > { %2011 = vmatpush3.bf16.msra.mxu1 %v2214_v18  ;;  %v2221_v18 = vld [vmem:[%s2878_s9 + $0x30] sm:$0xff]  }
 0x227   : > { %v1950_v25 = vpop.f32.mrb[0].mxu1 }
 0x228   : > { %v814_v26 = vadd.f32 %v1950_v25, %v1774_v24  ;;  %v805_v27 = vpop.f32.mrb[1].mxu1  ;;  %v1783_v25 = vld [vmem:[#allocation5] ss:$0 sm:$0xff] }
 0x229   : > { %v806_v28 = vadd.f32 %v1774_v24, %v805_v27  ;;  %v1951_v29 = vpop.f32.mrb[2].mxu1 }
 0x22a   : > { %v817_v30 = vadd.f32 %v1951_v29, %v1774_v24  ;;  %v808_v31 = vpop.f32.mrb[3].mxu1  ;;  %v870_v33 = vmax.f32 %v814_v26, 0.0 }
 0x22b   : > { %v809_v32 = vadd.f32 %v1774_v24, %v808_v31  ;;  %v868_v35 = vmax.f32 %v806_v28, 0.0 }
 0x22c   : > { %v871_v34 = vmax.f32 %v817_v30, 0.0 }
 0x22d   : > { %v869_v36 = vmax.f32 %v809_v32, 0.0 }
 0x22e   : > { %v885_v37 = vpack.c.bf16 %v871_v34, %v870_v33 }
 0x22f   : > { %v884_v38 = vpack.c.bf16 %v869_v36, %v868_v35  ;;  %v1954_v39 = vpop.f32.mrb[4].mxu1 }
 0x230   : > { %v830_v40 = vadd.f32 %v1954_v39, %v1774_v24  ;;  %v821_v41 = vpop.f32.mrb[5].mxu1 }
 0x231   : > { %v822_v42 = vadd.f32 %v1774_v24, %v821_v41  ;;  %v1955_v43 = vpop.f32.mrb[6].mxu1  ;;  %1980 = vmatprep.mubr.bf16.mxu0 %v884_v38 }
 0x232   : > { %v833_v44 = vadd.f32 %v1955_v43, %v1774_v24  ;;  %v824_v45 = vpop.f32.mrb[7].mxu1  ;;  %1981 = vmatmul.mubr.bf16.vlgmr.msra.gmra.mrb[16].mxu0 %v885_v37  ;;  %v874_v47 = vmax.f32 %v830_v40, 0.0 }
 0x233   : > { %v825_v46 = vadd.f32 %v1774_v24, %v824_v45  ;;  %v872_v49 = vmax.f32 %v822_v42, 0.0  ;;  %2029 = vmatpush3.bf16.msra.mxu0 %v2215_v19  ;;  %v2222_v19 = vld [vmem:[%s2878_s9 + $0x38] sm:$0xff]  }
 0x234   : > { %v875_v48 = vmax.f32 %v833_v44, 0.0  ;;  %2030 = vmatprep.subr.bf16.mxu0 %v2216_v20 }
 0x235   : > { %v873_v50 = vmax.f32 %v825_v46, 0.0 }
 0x236   : > { %v887_v51 = vpack.c.bf16 %v875_v48, %v874_v47 }
 0x237   : > { %v886_v52 = vpack.c.bf16 %v873_v50, %v872_v49  ;;  %v1958_v53 = vpop.f32.mrb[8].mxu1  ;;  %2031 = vmatpush3.bf16.msra.mxu0 %v2216_v20  ;;  %v2223_v20 = vld [vmem:[%s2880_s11] sm:$0xff]  }
 0x238   : > { %v846_v54 = vadd.f32 %v1958_v53, %v1774_v24  ;;  %v837_v55 = vpop.f32.mrb[9].mxu1  ;;  %2032 = vmatprep.subr.bf16.mxu0 %v2217_v21  ;;  %2092 = vmatprep.subr.bf16.mxu1 %v2223_v20 }
 0x239   : > { %v838_v56 = vadd.f32 %v1774_v24, %v837_v55  ;;  %v1959_v57 = vpop.f32.mrb[10].mxu1  ;;  %1984 = vmatprep.mubr.bf16.mxu0 %v886_v52 }
 0x23a   : > { %v849_v58 = vadd.f32 %v1959_v57, %v1774_v24  ;;  %v840_v59 = vpop.f32.mrb[11].mxu1  ;;  %1985 = vmatmul.mubr.bf16.gmra.mrb[20].mxu0 %v887_v51  ;;  %v878_v61 = vmax.f32 %v846_v54, 0.0 }
 0x23b   : > { %v841_v60 = vadd.f32 %v1774_v24, %v840_v59  ;;  %v876_v63 = vmax.f32 %v838_v56, 0.0  ;;  %2033 = vmatpush3.bf16.msra.mxu0 %v2217_v21  ;;  %v2224_v21 = vld [vmem:[%s2880_s11 + $0x8] sm:$0xff]  }
 0x23c   : > { %v879_v62 = vmax.f32 %v849_v58, 0.0  ;;  %2034 = vmatprep.subr.bf16.mxu0 %v2218_v22 }
 0x23d   : > { %v877_v0 = vmax.f32 %v841_v60, 0.0 }
 0x23e   : > { %v889_v1 = vpack.c.bf16 %v879_v62, %v878_v61 }
 0x23f   : > { %v888_v2 = vpack.c.bf16 %v877_v0, %v876_v63  ;;  %v1962_v3 = vpop.f32.mrb[12].mxu1  ;;  %2035 = vmatpush3.bf16.msra.mxu0 %v2218_v22  ;;  %v2225_v22 = vld [vmem:[%s2880_s11 + $0x10] sm:$0xff]  }
 0x240   : > { %v862_v4 = vadd.f32 %v1962_v3, %v1774_v24  ;;  %v853_v5 = vpop.f32.mrb[13].mxu1  ;;  %2036 = vmatprep.subr.bf16.mxu0 %v2219_v23 }
 0x241   : > { %v854_v6 = vadd.f32 %v1774_v24, %v853_v5  ;;  %v1963_v7 = vpop.f32.mrb[14].mxu1  ;;  %1988 = vmatprep.mubr.bf16.mxu0 %v888_v2 }
 0x242   : > { %v865_v8 = vadd.f32 %v1963_v7, %v1774_v24  ;;  %v856_v9 = vpop.f32.mrb[15].mxu1  ;;  %1989 = vmatmul.mubr.bf16.gmra.mrb[24].mxu0 %v889_v1  ;;  %v882_v11 = vmax.f32 %v862_v4, 0.0 }
 0x243   : > { %v857_v10 = vadd.f32 %v1774_v24, %v856_v9  ;;  %v880_v13 = vmax.f32 %v854_v6, 0.0  ;;  %v2220_v24 = vld [vmem:[%s2878_s9 + $0x28] sm:$0xff]   ;;  %2037 = vmatpush3.bf16.msra.mxu0 %v2219_v23  ;;  %v2742_v23 = vld [vmem:[%s2880_s11 + $0x18] sm:$0xff]  }
 0x244   : > { %v883_v12 = vmax.f32 %v865_v8, 0.0  ;;  %2038 = vmatprep.subr.bf16.mxu0 %v2220_v24 }
 0x245   : > { %v881_v14 = vmax.f32 %v857_v10, 0.0 }
 0x246   : > { %v891_v15 = vpack.c.bf16 %v883_v12, %v882_v11 }
 0x247   : > { %v890_v16 = vpack.c.bf16 %v881_v14, %v880_v13  ;;  %2039 = vmatpush3.bf16.msra.mxu0 %v2220_v24  ;;  %v2748_v24 = vld [vmem:[%s2880_s11 + $0x20] sm:$0xff]  }
 0x248   : > { %2040 = vmatprep.subr.bf16.mxu0 %v2221_v18 }
 0x249   : > { %1992 = vmatprep.mubr.bf16.mxu0 %v890_v16 }
 0x24a   : > { %1993 = vmatmul.mubr.bf16.gmra.mrb[28].mxu0 %v891_v15 }
 0x24b   : > { %2041 = vmatpush3.bf16.msra.mxu0 %v2221_v18 }
 0x24c   : > { %2042 = vmatprep.subr.bf16.mxu0 %v2222_v19 }
 0x24f   : > { %2043 = vmatpush3.bf16.msra.mxu0 %v2222_v19  ;;  %v2229_v19 = vld [vmem:[%s2880_s11 + $0x30] sm:$0xff]  }
 0x250   : > { %2060 = vmatprep.subr.bf16.mxu0 %v2223_v20 }
 0x305   : > { %v1982_v26 = vpop.f32.mrb[16].mxu0 }
 0x306   : > { %v1006_v27 = vadd.f32 %v1982_v26, %v1783_v25  ;;  %v997_v28 = vpop.f32.mrb[17].mxu0  ;;  %v2760_v26 = vld [vmem:[#allocation7] ss:$0 sm:$0xff] }
 0x307   : > { %v998_v29 = vadd.f32 %v1783_v25, %v997_v28  ;;  %v1983_v30 = vpop.f32.mrb[18].mxu0 }
 0x308   : > { %v1009_v31 = vadd.f32 %v1983_v30, %v1783_v25  ;;  %v1000_v32 = vpop.f32.mrb[19].mxu0  ;;  %v1062_v34 = vmax.f32 %v1006_v27, 0.0 }
 0x309   : > { %v1001_v33 = vadd.f32 %v1783_v25, %v1000_v32  ;;  %v1060_v36 = vmax.f32 %v998_v29, 0.0 }
 0x30a   : > { %v1063_v35 = vmax.f32 %v1009_v31, 0.0 }
 0x30b   : > { %v1061_v37 = vmax.f32 %v1001_v33, 0.0 }
 0x30c   : > { %v1077_v38 = vpack.c.bf16 %v1063_v35, %v1062_v34 }
 0x30d   : > { %v1076_v39 = vpack.c.bf16 %v1061_v37, %v1060_v36  ;;  %v1986_v40 = vpop.f32.mrb[20].mxu0 }
 0x30e   : > { %v1022_v41 = vadd.f32 %v1986_v40, %v1783_v25  ;;  %v1013_v42 = vpop.f32.mrb[21].mxu0 }
 0x30f   : > { %v1014_v43 = vadd.f32 %v1783_v25, %v1013_v42  ;;  %v1987_v44 = vpop.f32.mrb[22].mxu0  ;;  %2012 = vmatprep.mubr.bf16.mxu1 %v1076_v39 }
 0x310   : > { %v1025_v45 = vadd.f32 %v1987_v44, %v1783_v25  ;;  %v1016_v46 = vpop.f32.mrb[23].mxu0  ;;  %2013 = vmatmul.mubr.bf16.vlgmr.msra.gmra.mrb[16].mxu1 %v1077_v38  ;;  %v1066_v48 = vmax.f32 %v1022_v41, 0.0 }
 0x311   : > { %v1017_v47 = vadd.f32 %v1783_v25, %v1016_v46  ;;  %v1064_v50 = vmax.f32 %v1014_v43, 0.0  ;;  %2100 = vmatpush3.bf16.msra.mxu1 %v2223_v20 }
 0x312   : > { %v1067_v49 = vmax.f32 %v1025_v45, 0.0  ;;  %2093 = vmatprep.subr.bf16.mxu1 %v2224_v21 }
 0x313   : > { %v1065_v51 = vmax.f32 %v1017_v47, 0.0 }
 0x314   : > { %v1079_v52 = vpack.c.bf16 %v1067_v49, %v1066_v48 }
 0x315   : > { %v1078_v53 = vpack.c.bf16 %v1065_v51, %v1064_v50  ;;  %v1990_v54 = vpop.f32.mrb[24].mxu0  ;;  %2101 = vmatpush3.bf16.msra.mxu1 %v2224_v21 }
 0x316   : > { %v1038_v55 = vadd.f32 %v1990_v54, %v1783_v25  ;;  %v1029_v56 = vpop.f32.mrb[25].mxu0  ;;  %2094 = vmatprep.subr.bf16.mxu1 %v2225_v22 }
 0x317   : > { %v1030_v57 = vadd.f32 %v1783_v25, %v1029_v56  ;;  %v1991_v58 = vpop.f32.mrb[26].mxu0  ;;  %2016 = vmatprep.mubr.bf16.mxu1 %v1078_v53 }
 0x318   : > { %v1041_v59 = vadd.f32 %v1991_v58, %v1783_v25  ;;  %v1032_v60 = vpop.f32.mrb[27].mxu0  ;;  %2017 = vmatmul.mubr.bf16.gmra.mrb[20].mxu1 %v1079_v52  ;;  %v1070_v62 = vmax.f32 %v1038_v55, 0.0 }
 0x319   : > { %v1033_v61 = vadd.f32 %v1783_v25, %v1032_v60  ;;  %v1068_v0 = vmax.f32 %v1030_v57, 0.0  ;;  %2102 = vmatpush3.bf16.msra.mxu1 %v2225_v22 }
 0x31a   : > { %v1071_v63 = vmax.f32 %v1041_v59, 0.0  ;;  %2095 = vmatprep.subr.bf16.mxu1 %v2742_v23 }
 0x31b   : > { %v1069_v1 = vmax.f32 %v1033_v61, 0.0 }
 0x31c   : > { %v1081_v2 = vpack.c.bf16 %v1071_v63, %v1070_v62 }
 0x31d   : > { %v1080_v3 = vpack.c.bf16 %v1069_v1, %v1068_v0  ;;  %v1994_v4 = vpop.f32.mrb[28].mxu0  ;;  %2103 = vmatpush3.bf16.msra.mxu1 %v2742_v23 }
 0x31e   : > { %v1054_v5 = vadd.f32 %v1994_v4, %v1783_v25  ;;  %v1045_v6 = vpop.f32.mrb[29].mxu0  ;;  %2096 = vmatprep.subr.bf16.mxu1 %v2748_v24 }
 0x31f   : > { %v1046_v7 = vadd.f32 %v1783_v25, %v1045_v6  ;;  %v1995_v8 = vpop.f32.mrb[30].mxu0  ;;  %2020 = vmatprep.mubr.bf16.mxu1 %v1080_v3 }
 0x320   : > { %v1057_v9 = vadd.f32 %v1995_v8, %v1783_v25  ;;  %v1048_v10 = vpop.f32.mrb[31].mxu0  ;;  %2021 = vmatmul.mubr.bf16.gmra.mrb[24].mxu1 %v1081_v2  ;;  %v1074_v12 = vmax.f32 %v1054_v5, 0.0 }
 0x321   : > { %v1049_v11 = vadd.f32 %v1783_v25, %v1048_v10  ;;  %v1072_v14 = vmax.f32 %v1046_v7, 0.0  ;;  %v2755_v25 = vld [vmem:[%s2880_s11 + $0x28] sm:$0xff]   ;;  %2104 = vmatpush3.bf16.msra.mxu1 %v2748_v24 }
 0x322   : > { %v1075_v13 = vmax.f32 %v1057_v9, 0.0  ;;  %2097 = vmatprep.subr.bf16.mxu1 %v2755_v25 }
 0x323   : > { %v1073_v15 = vmax.f32 %v1049_v11, 0.0 }
 0x324   : > { %v1083_v16 = vpack.c.bf16 %v1075_v13, %v1074_v12 }
 0x325   : > { %v1082_v17 = vpack.c.bf16 %v1073_v15, %v1072_v14  ;;  %2105 = vmatpush3.bf16.msra.mxu1 %v2755_v25 }
 0x326   : > { %2098 = vmatprep.subr.bf16.mxu1 %v2229_v19 }
 0x327   : > { %2024 = vmatprep.mubr.bf16.mxu1 %v1082_v17 }
 0x328   : > { %2025 = vmatmul.mubr.bf16.gmra.mrb[28].mxu1 %v1083_v16 }
 0x329   : > { %2106 = vmatpush3.bf16.msra.mxu1 %v2229_v19 }
 0x3e3   : > { %v2014_v27 = vpop.f32.mrb[16].mxu1 }
 0x3e4   : > { %v1198_v28 = vadd.f32 %v2014_v27, %v2760_v26  ;;  %v1189_v29 = vpop.f32.mrb[17].mxu1 }
 0x3e5   : > { %v1190_v30 = vadd.f32 %v2760_v26, %v1189_v29  ;;  %v2015_v31 = vpop.f32.mrb[18].mxu1 }
 0x3e6   : > { %v1201_v32 = vadd.f32 %v2015_v31, %v2760_v26  ;;  %v1192_v33 = vpop.f32.mrb[19].mxu1  ;;  %v1254_v35 = vmax.f32 %v1198_v28, 0.0 }
 0x3e7   : > { %v1193_v34 = vadd.f32 %v2760_v26, %v1192_v33  ;;  %v1252_v37 = vmax.f32 %v1190_v30, 0.0 }
 0x3e8   : > { %v1255_v36 = vmax.f32 %v1201_v32, 0.0 }
 0x3e9   : > { %v1253_v38 = vmax.f32 %v1193_v34, 0.0 }
 0x3ea   : > { %v1269_v39 = vpack.c.bf16 %v1255_v36, %v1254_v35 }
 0x3eb   : > { %v1268_v40 = vpack.c.bf16 %v1253_v38, %v1252_v37  ;;  %v2018_v41 = vpop.f32.mrb[20].mxu1 }
 0x3ec   : > { %v1214_v42 = vadd.f32 %v2018_v41, %v2760_v26  ;;  %v1205_v43 = vpop.f32.mrb[21].mxu1 }
 0x3ed   : > { %v1206_v44 = vadd.f32 %v2760_v26, %v1205_v43  ;;  %v2019_v45 = vpop.f32.mrb[22].mxu1  ;;  %2044 = vmatprep.mubr.bf16.mxu0 %v1268_v40 }
 0x3ee   : > { %v1217_v46 = vadd.f32 %v2019_v45, %v2760_v26  ;;  %v1208_v47 = vpop.f32.mrb[23].mxu1  ;;  %2045 = vmatmul.mubr.bf16.vlgmr.msra.gmra.mrb[32].mxu0 %v1269_v39  ;;  %v1258_v49 = vmax.f32 %v1214_v42, 0.0 }
 0x3ef   : > { %v1209_v48 = vadd.f32 %v2760_v26, %v1208_v47  ;;  %2061 = vmatpush3.bf16.msra.mxu0 %v2223_v20  ;;  %v1256_v51 = vmax.f32 %v1206_v44, 0.0  ;;  %v2230_v20 = vld [vmem:[%s2880_s11 + $0x38] sm:$0xff]  }
 0x3f0   : > { %v1259_v50 = vmax.f32 %v1217_v46, 0.0  ;;  %2062 = vmatprep.subr.bf16.mxu0 %v2224_v21  ;;  %2099 = vmatprep.subr.bf16.mxu1 %v2230_v20 }
 0x3f1   : > { %v1257_v52 = vmax.f32 %v1209_v48, 0.0  ;;  %2107 = vmatpush3.bf16.msra.mxu1 %v2230_v20 }
 0x3f2   : > { %v1271_v53 = vpack.c.bf16 %v1259_v50, %v1258_v49 }
 0x3f3   : > { %v1270_v54 = vpack.c.bf16 %v1257_v52, %v1256_v51  ;;  %v2022_v55 = vpop.f32.mrb[24].mxu1  ;;  %2063 = vmatpush3.bf16.msra.mxu0 %v2224_v21 }
 0x3f4   : > { %v1230_v56 = vadd.f32 %v2022_v55, %v2760_v26  ;;  %v1221_v57 = vpop.f32.mrb[25].mxu1  ;;  %2064 = vmatprep.subr.bf16.mxu0 %v2225_v22 }
 0x3f5   : > { %v1222_v58 = vadd.f32 %v2760_v26, %v1221_v57  ;;  %v2023_v59 = vpop.f32.mrb[26].mxu1  ;;  %2048 = vmatprep.mubr.bf16.mxu0 %v1270_v54 }
 0x3f6   : > { %v1233_v60 = vadd.f32 %v2023_v59, %v2760_v26  ;;  %v1224_v61 = vpop.f32.mrb[27].mxu1  ;;  %2049 = vmatmul.mubr.bf16.gmra.mrb[36].mxu0 %v1271_v53  ;;  %v1262_v63 = vmax.f32 %v1230_v56, 0.0 }
 0x3f7   : > { %v1225_v62 = vadd.f32 %v2760_v26, %v1224_v61  ;;  %2065 = vmatpush3.bf16.msra.mxu0 %v2225_v22  ;;  %v1260_v1 = vmax.f32 %v1222_v58, 0.0  ;;  %v1801_v22 = vld [vmem:[%s2879_s10] ss:$0 sm:$0xff] }
 0x3f8   : > { %v1263_v0 = vmax.f32 %v1233_v60, 0.0  ;;  %2066 = vmatprep.subr.bf16.mxu0 %v2742_v23 }
 0x3f9   : > { %v1261_v2 = vmax.f32 %v1225_v62, 0.0  ;;  %v1810_v62 = vld [vmem:[%s2881_s12] ss:$0 sm:$0xff] }
 0x3fa   : > { %v1273_v3 = vpack.c.bf16 %v1263_v0, %v1262_v63 }
 0x3fb   : > { %v1272_v4 = vpack.c.bf16 %v1261_v2, %v1260_v1  ;;  %v2026_v5 = vpop.f32.mrb[28].mxu1  ;;  %2067 = vmatpush3.bf16.msra.mxu0 %v2742_v23 }
 0x3fc   : > { %v1246_v6 = vadd.f32 %v2026_v5, %v2760_v26  ;;  %v1237_v7 = vpop.f32.mrb[29].mxu1  ;;  %2068 = vmatprep.subr.bf16.mxu0 %v2748_v24 }
 0x3fd   : > { %v1238_v8 = vadd.f32 %v2760_v26, %v1237_v7  ;;  %v2027_v9 = vpop.f32.mrb[30].mxu1  ;;  %2052 = vmatprep.mubr.bf16.mxu0 %v1272_v4 }
 0x3fe   : > { %v1249_v10 = vadd.f32 %v2027_v9, %v2760_v26  ;;  %v1240_v11 = vpop.f32.mrb[31].mxu1  ;;  %2053 = vmatmul.mubr.bf16.gmra.mrb[40].mxu0 %v1273_v3  ;;  %v1266_v13 = vmax.f32 %v1246_v6, 0.0 }
 0x3ff   : > { %v1241_v12 = vadd.f32 %v2760_v26, %v1240_v11  ;;  %2069 = vmatpush3.bf16.msra.mxu0 %v2748_v24  ;;  %v1264_v15 = vmax.f32 %v1238_v8, 0.0 }
 0x400   : > { %v1267_v14 = vmax.f32 %v1249_v10, 0.0  ;;  %2070 = vmatprep.subr.bf16.mxu0 %v2755_v25 }
 0x401   : > { %v1265_v16 = vmax.f32 %v1241_v12, 0.0 }
 0x402   : > { %v1275_v17 = vpack.c.bf16 %v1267_v14, %v1266_v13 }
 0x403   : > { %v1274_v18 = vpack.c.bf16 %v1265_v16, %v1264_v15  ;;  %2071 = vmatpush3.bf16.msra.mxu0 %v2755_v25 }
 0x404   : > { %2072 = vmatprep.subr.bf16.mxu0 %v2229_v19 }
 0x405   : > { %2056 = vmatprep.mubr.bf16.mxu0 %v1274_v18 }
 0x406   : > { %2057 = vmatmul.mubr.bf16.gmra.mrb[44].mxu0 %v1275_v17 }
 0x407   : > { %2073 = vmatpush3.bf16.msra.mxu0 %v2229_v19 }
 0x408   : > { %2074 = vmatprep.subr.bf16.mxu0 %v2230_v20 }
 0x40b   : > { %2075 = vmatpush3.bf16.msra.mxu0 %v2230_v20 }
 0x4c1   : > { %v2046_v21 = vpop.f32.mrb[32].mxu0 }
 0x4c2   : > { %v1381_v23 = vpop.f32.mrb[33].mxu0  ;;  %v1390_v25 = vadd.f32 %v2046_v21, %v1801_v22 }
 0x4c3   : > { %v2047_v24 = vpop.f32.mrb[34].mxu0  ;;  %v1382_v28 = vadd.f32 %v1801_v22, %v1381_v23 }
 0x4c4   : > { %v1393_v26 = vadd.f32 %v2047_v24, %v1801_v22  ;;  %v1384_v27 = vpop.f32.mrb[35].mxu0 }
 0x4c5   : > { %v1385_v29 = vadd.f32 %v1801_v22, %v1384_v27 }
 0x4c6   : > { %v1445_v30 = vpack.c.bf16 %v1393_v26, %v1390_v25 }
 0x4c7   : > { %v1444_v31 = vpack.c.bf16 %v1385_v29, %v1382_v28 }
 0x4c9   : > { %v2050_v32 = vpop.f32.mrb[36].mxu0  ;;  %2076 = vmatprep.mubr.bf16.mxu0 %v1444_v31 }
 0x4ca   : > { %v1397_v33 = vpop.f32.mrb[37].mxu0  ;;  %2077 = vmatmul.mubr.bf16.vlgmr.msra.gmra.mrb[48].mxu0 %v1445_v30  ;;  %v1406_v35 = vadd.f32 %v2050_v32, %v1801_v22 }
 0x4cb   : > { %v2051_v34 = vpop.f32.mrb[38].mxu0  ;;  %v1398_v38 = vadd.f32 %v1801_v22, %v1397_v33 }
 0x4cc   : > { %v1409_v36 = vadd.f32 %v2051_v34, %v1801_v22  ;;  %v1400_v37 = vpop.f32.mrb[39].mxu0 }
 0x4cd   : > { %v1401_v39 = vadd.f32 %v1801_v22, %v1400_v37 }
 0x4ce   : > { %v1447_v40 = vpack.c.bf16 %v1409_v36, %v1406_v35 }
 0x4cf   : > { %v1446_v41 = vpack.c.bf16 %v1401_v39, %v1398_v38 }
 0x4d1   : > { %v2054_v42 = vpop.f32.mrb[40].mxu0  ;;  %2080 = vmatprep.mubr.bf16.mxu1 %v1446_v41 }
 0x4d2   : > { %v1413_v43 = vpop.f32.mrb[41].mxu0  ;;  %2081 = vmatmul.mubr.bf16.vlgmr.msra.gmra.mrb[32].mxu1 %v1447_v40  ;;  %v1422_v45 = vadd.f32 %v2054_v42, %v1801_v22 }
 0x4d3   : > { %v2055_v44 = vpop.f32.mrb[42].mxu0  ;;  %v1414_v48 = vadd.f32 %v1801_v22, %v1413_v43 }
 0x4d4   : > { %v1425_v46 = vadd.f32 %v2055_v44, %v1801_v22  ;;  %v1416_v47 = vpop.f32.mrb[43].mxu0 }
 0x4d5   : > { %v1417_v49 = vadd.f32 %v1801_v22, %v1416_v47 }
 0x4d6   : > { %v1449_v50 = vpack.c.bf16 %v1425_v46, %v1422_v45 }
 0x4d7   : > { %v1448_v51 = vpack.c.bf16 %v1417_v49, %v1414_v48 }
 0x4d9   : > { %v2058_v52 = vpop.f32.mrb[44].mxu0  ;;  %2084 = vmatprep.mubr.bf16.mxu1 %v1448_v51 }
 0x4da   : > { %v1429_v53 = vpop.f32.mrb[45].mxu0  ;;  %2085 = vmatmul.mubr.bf16.gmra.mrb[36].mxu1 %v1449_v50  ;;  %v1438_v55 = vadd.f32 %v2058_v52, %v1801_v22 }
 0x4db   : > { %v2059_v54 = vpop.f32.mrb[46].mxu0  ;;  %v1430_v58 = vadd.f32 %v1801_v22, %v1429_v53 }
 0x4dc   : > { %v1441_v56 = vadd.f32 %v2059_v54, %v1801_v22  ;;  %v1432_v57 = vpop.f32.mrb[47].mxu0 }
 0x4dd   : > { %v1433_v59 = vadd.f32 %v1801_v22, %v1432_v57 }
 0x4de   : > { %v1451_v60 = vpack.c.bf16 %v1441_v56, %v1438_v55 }
 0x4df   : > { %v1450_v61 = vpack.c.bf16 %v1433_v59, %v1430_v58 }
 0x4e1   : > { %2088 = vmatprep.mubr.bf16.mxu1 %v1450_v61 }
 0x4e2   : > { %2089 = vmatmul.mubr.bf16.gmra.mrb[40].mxu1 %v1451_v60 }
 0x59d   : > { %v2078_v63 = vpop.f32.mrb[48].mxu0 }
 0x59e   : > { %v1566_v0 = vadd.f32 %v2078_v63, %v1810_v62  ;;  %v1557_v1 = vpop.f32.mrb[49].mxu0 }
 0x59f   : > { %v1558_v2 = vadd.f32 %v1810_v62, %v1557_v1  ;;  %v2079_v3 = vpop.f32.mrb[50].mxu0 }
 0x5a0   : > { %1622 = vst [vmem:[%s2799_s28 + $0x10] sm:$0xff] %v1566_v0  ;;  %v1569_v4 = vadd.f32 %v2079_v3, %v1810_v62  ;;  %v1560_v5 = vpop.f32.mrb[51].mxu0 }
 0x5a1   : > { %1620 = vst [vmem:[%s2799_s28] sm:$0xff] %v1558_v2  ;;  %v1561_v6 = vadd.f32 %v1810_v62, %v1560_v5 }
 0x5a2   : > { %1623 = vst [vmem:[%s2799_s28 + $0x18] sm:$0xff] %v1569_v4 }
 0x5a3   : > { %1621 = vst [vmem:[%s2799_s28 + $0x8] sm:$0xff] %v1561_v6 }
 0x5a5   : > { %v2082_v7 = vpop.f32.mrb[32].mxu1 }
 0x5a6   : > { %v1582_v8 = vadd.f32 %v2082_v7, %v1810_v62  ;;  %v1573_v9 = vpop.f32.mrb[33].mxu1 }
 0x5a7   : > { %v1574_v10 = vadd.f32 %v1810_v62, %v1573_v9  ;;  %v2083_v11 = vpop.f32.mrb[34].mxu1 }
 0x5a8   : > { %1626 = vst [vmem:[%s2799_s28 + $0x30] sm:$0xff] %v1582_v8  ;;  %v1585_v12 = vadd.f32 %v2083_v11, %v1810_v62  ;;  %v1576_v13 = vpop.f32.mrb[35].mxu1 }
 0x5a9   : > { %1624 = vst [vmem:[%s2799_s28 + $0x20] sm:$0xff] %v1574_v10  ;;  %v1577_v14 = vadd.f32 %v1810_v62, %v1576_v13 }
 0x5aa   : > { %1627 = vst [vmem:[%s2799_s28 + $0x38] sm:$0xff] %v1585_v12 }
 0x5ab   : > { %1625 = vst [vmem:[%s2799_s28 + $0x28] sm:$0xff] %v1577_v14 }
 0x5ad   : > { %v2086_v15 = vpop.f32.mrb[36].mxu1 }
 0x5ae   : > { %v1598_v16 = vadd.f32 %v2086_v15, %v1810_v62  ;;  %v1589_v17 = vpop.f32.mrb[37].mxu1 }
 0x5af   : > { %v1590_v18 = vadd.f32 %v1810_v62, %v1589_v17  ;;  %v2087_v19 = vpop.f32.mrb[38].mxu1 }
 0x5b0   : > { %1630 = vst [vmem:[%s2799_s28 + $0x50] sm:$0xff] %v1598_v16  ;;  %v1601_v20 = vadd.f32 %v2087_v19, %v1810_v62  ;;  %v1592_v21 = vpop.f32.mrb[39].mxu1 }
 0x5b1   : > { %1628 = vst [vmem:[%s2799_s28 + $0x40] sm:$0xff] %v1590_v18  ;;  %v1593_v22 = vadd.f32 %v1810_v62, %v1592_v21 }
 0x5b2   : > { %1631 = vst [vmem:[%s2799_s28 + $0x58] sm:$0xff] %v1601_v20 }
 0x5b3   : > { %1629 = vst [vmem:[%s2799_s28 + $0x48] sm:$0xff] %v1593_v22 }
 0x5b5   : > { %v2090_v23 = vpop.f32.mrb[40].mxu1 }
 0x5b6   : > { %v1614_v24 = vadd.f32 %v2090_v23, %v1810_v62  ;;  %v1605_v25 = vpop.f32.mrb[41].mxu1 }
 0x5b7   : > { %v1606_v26 = vadd.f32 %v1810_v62, %v1605_v25  ;;  %v2091_v27 = vpop.f32.mrb[42].mxu1 }
 0x5b8   : > { %1634 = vst [vmem:[%s2799_s28 + $0x70] sm:$0xff] %v1614_v24  ;;  %v1617_v28 = vadd.f32 %v2091_v27, %v1810_v62  ;;  %v1608_v29 = vpop.f32.mrb[43].mxu1 }
 0x5b9   : > { %1632 = vst [vmem:[%s2799_s28 + $0x60] sm:$0xff] %v1606_v26  ;;  %v1609_v30 = vadd.f32 %v1810_v62, %v1608_v29 }
 0x5ba   : > { %1635 = vst [vmem:[%s2799_s28 + $0x78] sm:$0xff] %v1617_v28 }
 0x5bb   : > { %1633 = vst [vmem:[%s2799_s28 + $0x68] sm:$0xff] %v1609_v30 }
 0x5bc   : > { %2328 = shalt.err (!%p2325_p11)
}
 0x5bd   : > { %s2329_s14 = scalar_lea.hbm %s2819_s23, 2048  ;;  %s2333_s24 = scalar_lea.hbm %s2912_s19, 8192 }
 0x5be   : > { %p2330_p13 = scmp.ne.s32.totalorder %s2819_s23, %s2329_s14  ;;  %p2334_p6 = scmp.lt.u32.totalorder %s2819_s23, %s2912_s19 }
 0x5bf   : > { %p2335_p5 = scmp.lt.u32.totalorder %s2333_s24, %s2329_s14  ;;  %p2337_p12 = scmp.lt.u32.totalorder %s2329_s14, %s2819_s23 }
 0x5c0   : > { %p2331_p1 = pnand %p2330_p13, %p2913_p10 }
 0x5c1   : > { %p2336_p9 = por %p2335_p5, %p2334_p6 }
 0x5c2   : > { %p2332_p0 = pneg %p2331_p1 }
 0x5c3   : > { %p2338_p2 = por %p2337_p12, %p2336_p9 }
 0x5c5   : > { %p2339_p3 = pnand %p2338_p2, %p2332_p0 }
 0x5c7   : > { %2342 = shalt.err (!%p2339_p3)
}
 0x5c8   : > { %s2393_s6 = smov 128   ;;  %s2394_s16 = smov 8  }
 0x5c9   : > { %2120 = dma.vmem_to_hbm [thread:$0]  (%p2913_p10), %s2821_s30, 2048, %s2819_s23, %s2828_s29, %s2393_s6, %s2393_s6, %s2394_s16  }
 0x5ca PF: > { %s2914_s20 = sld [smem:[#allocation14_spill]]  ;;  %s2915_s25 = sld [smem:[#allocation12_spill]] }
 0x5cb   : > { %s2916_s21 = sld [smem:[#allocation17_spill]] }
 0x5d0   : > { %p2142_p4 = scmp.ge.s32.totalorder %s2914_s20, 2  ;;  %s1665_s15 = sand.u32 1, %s2915_s25  }
 0x5d1   : > { %p2917_p7 = scmp.ne.s32.totalorder %s2916_s21, 0  ;;  %s1666_s27 = scalar_lea.sflag [#allocation4], %s1665_s15 }
 0x5d3   : > { %p2133_p8 = pnand %p2142_p4, %p2917_p7 }
 0x5d5   : > { %2368 = dma.done.wait (!%p2133_p8), %s1666_s27, 2048  }
 0x5d6   : > { %2370 = vsyncadd (!%p2133_p8), %s1666_s27, 4294965248  ;;  %s2918_s28 = sld [smem:[#allocation15_spill]]  ;;  %s2919_s14 = sld [smem:[#allocation13_spill]] }
 0x5d7   : > { %s2920_s27 = sld [smem:[#allocation16_spill]]  ;;  %s2921_s25 = smov %s2377_s26 }
 0x5dc   : > { %p25_p11 = scmp.ge.s32.totalorder %s2918_s28, 6   ;;  %s2922_s26 = smov %s2919_s14 }
 0x5de   :  { %27 = sbr.rel (!%p25_p11) target bundleno = 8 (0x8), region = 120 }
 0x5e5   :  { %1671 = vsyncpa [#allocation3], 1 }
 0x5e6   :  { %1673 = vsyncpa [#allocation3 + $0x1], 1 }
 0x5e7   :  { %1674 = vsyncpa [#allocation6], 1 }
 0x5e8   :  { %1675 = vsyncpa [#allocation4], 1 }
 0x5e9   :  { %1677 = vsyncpa [#allocation4 + $0x1], 1 }

</bundles_post_ra>
